<compile_context>
chip_gen: v7x
topology: tpu7x:2x2x1
jax: 0.10.0
libtpu: 0.0.40
codegen_flags: <defaults>
</compile_context>

<pallas_src>
import math
import functools

import jax
import jax.numpy as jnp
from jax.experimental import pallas as pl
from jax.experimental.pallas import tpu as pltpu


def _wavefront_lstm_kernel(x_ref, w0_ref, wc_ref, b_ref,
                           y_ref, hN_ref, cN_ref,
                           base_ref,
                           *, T, Bp, H, L):
    """All L layers x T timesteps, wavefront-scheduled, in a single grid step.

    Lane layout ("gate-major"): column g*(L*H) + l*H + j == gate g (kernel order
    i,f,o,g), layer l, hidden unit j.  h_all / c_all hold every layer's state in one
    (Bp, L*H) vector; at wavefront step s, layer l's lane block is timestep t = s - l.

      x_ref   : (T*Bp, F)       timestep-major input, batch padded to Bp
      w0_ref  : (F, 4*L*H)      layer-0 W_ih^T scattered into layer-0 gate columns
      wc_ref  : (L*H, 4*L*H)    banded weight: row block l -> W_hh_l^T (layer-l cols)
                                and W_ih_{l+1}^T (layer-(l+1) cols)
      b_ref   : (1, 4*L*H)      fused b_ih + b_hh for all layers
      y_ref   : (T*Bp, L*H)     wide sequence output (wrapper keeps layer L-1 lanes)
      hN_ref  : (L, Bp, L*H)    wide final h; row l snapshotted at layer l's last step
      cN_ref  : (L, Bp, L*H)    wide final c
      base_ref: (T*Bp, 4*L*H)   VMEM scratch: hoisted layer-0 projection + all biases
    """
    LH = L * H
    G = 4 * LH
    S = T + L - 1

    # Hoisted non-recurrent projection: ONE dense matmul for all timesteps.
    base_ref[...] = (
        jnp.dot(x_ref[...], w0_ref[...], preferred_element_type=jnp.float32)
        + b_ref[...])

    w_band = wc_ref[...]                                     # reused every step
    bias_full = jnp.broadcast_to(b_ref[...], (Bp, G))        # hoisted out of loop
    lane = jax.lax.broadcasted_iota(jnp.int32, (Bp, LH), 1)  # hoisted out of loop

    h_all = jnp.zeros((Bp, LH), jnp.float32)
    c_all = jnp.zeros((Bp, LH), jnp.float32)

    for s in range(S):                                       # fully unrolled, S = 11
        # Layer 0 consumes gx0[t=s] (+ all biases) from the hoisted projection;
        # after layer 0 retires only the biases remain.
        add = base_ref[s * Bp:(s + 1) * Bp, :] if s < T else bias_full

        # ONE banded block-diagonal matmul advances all L layers one timestep:
        # layer l gets h^{l-1}_t @ W_ih_l^T + h^l_{t-1} @ W_hh_l^T from a single pass.
        z = jnp.dot(h_all, w_band, preferred_element_type=jnp.float32) + add  # (Bp, G)

        sig = jax.nn.sigmoid(z[:, :3 * LH])                  # i|f|o, vreg-aligned
        g_all = jnp.tanh(z[:, 3 * LH:])                      # g, vreg-aligned
        i_all = sig[:, 0 * LH:1 * LH]
        f_all = sig[:, 1 * LH:2 * LH]
        o_all = sig[:, 2 * LH:3 * LH]

        c_new = f_all * c_all + i_all * g_all                # all layers at once
        h_new = o_all * jnp.tanh(c_new)

        if s < L - 1:
            # Layers that have not entered the wavefront yet must keep zero state.
            keep = lane < (s + 1) * H
            c_new = jnp.where(keep, c_new, 0.0)
            h_new = jnp.where(keep, h_new, 0.0)
        c_all, h_all = c_new, h_new

        if s >= L - 1:                                       # last layer emits timestep t
            t = s - (L - 1)
            y_ref[t * Bp:(t + 1) * Bp, :] = h_all            # full (8,128) lane-dense store
        if s >= T - 1:                                       # layer l just produced h_T/c_T
            l = s - (T - 1)
            hN_ref[l] = h_all
            cN_ref[l] = c_all


_PT_GATE = (0, 1, 3, 2)   # kernel gate order (i, f, o, g) -> PyTorch row block (i, f, g, o)


def _gate_block_t(w, g, H):
    """Transposed gate-g block (kernel order) of a PyTorch-stacked (4H, X) weight -> (X, H)."""
    pt = _PT_GATE[g]
    return jnp.transpose(w[pt * H:(pt + 1) * H, :])


@jax.jit
def lstm_encoder_forward(x, params_flat):
    """x: (B, T, input_size) float32 (batch_first, as in the PyTorch module).

    params_flat: tuple of (w_ih (4H,F_l), w_hh (4H,H), b_ih (4H,), b_hh (4H,)) per layer.
    Returns (lstm_out (B, T, H), (h_n (L, B, H), c_n (L, B, H))).
    """
    B, T, F = x.shape
    L = len(params_flat)
    H = params_flat[0][1].shape[1]                           # w_hh: (4H, H)
    LH = L * H
    G = 4 * LH
    Bp = ((B + 7) // 8) * 8                                  # pad batch to a full sublane tile

    # Timestep-major, batch-padded input: (B,T,F) -> (T,Bp,F) -> (T*Bp, F)
    x_tm = jnp.transpose(x, (1, 0, 2)).astype(jnp.float32)
    x_tm = jnp.pad(x_tm, ((0, 0), (0, Bp - B), (0, 0)))
    x2d = x_tm.reshape(T * Bp, F)

    # ---- Pack weights into the gate-major banded block-diagonal layout ----
    w0 = jnp.zeros((F, G), jnp.float32)                      # layer-0 input weights
    wc = jnp.zeros((LH, G), jnp.float32)                     # banded recurrent+input weights
    bias = jnp.zeros((1, G), jnp.float32)                    # fused biases, all layers
    for g in range(4):
        c0 = g * LH
        pt = _PT_GATE[g]
        w0 = w0.at[:, c0:c0 + H].set(_gate_block_t(params_flat[0][0], g, H))
        for l in range(L):
            _, w_hh, b_ih, b_hh = params_flat[l]
            wc = wc.at[l * H:(l + 1) * H, c0 + l * H:c0 + (l + 1) * H].set(
                _gate_block_t(w_hh, g, H))                   # recurrent: h^l -> layer l
            if l + 1 < L:
                wc = wc.at[l * H:(l + 1) * H, c0 + (l + 1) * H:c0 + (l + 2) * H].set(
                    _gate_block_t(params_flat[l + 1][0], g, H))  # input: h^l -> layer l+1
            bias = bias.at[0, c0 + l * H:c0 + (l + 1) * H].set(
                (b_ih + b_hh)[pt * H:(pt + 1) * H])

    kernel = functools.partial(_wavefront_lstm_kernel, T=T, Bp=Bp, H=H, L=L)
    vspec = lambda: pl.BlockSpec(memory_space=pltpu.MemorySpace.VMEM)

    y_wide, hN_wide, cN_wide = pl.pallas_call(
        kernel,
        out_shape=(
            jax.ShapeDtypeStruct((T * Bp, LH), jnp.float32),
            jax.ShapeDtypeStruct((L, Bp, LH), jnp.float32),
            jax.ShapeDtypeStruct((L, Bp, LH), jnp.float32),
        ),
        in_specs=[vspec(), vspec(), vspec(), vspec()],
        out_specs=(vspec(), vspec(), vspec()),
        scratch_shapes=[pltpu.VMEM((T * Bp, G), jnp.float32)],
    )(x2d, w0, wc, bias)

    # Un-pad / un-widen in the wrapper (layout plumbing, not compute).
    lstm_out = jnp.transpose(
        y_wide.reshape(T, Bp, LH)[:, :B, (L - 1) * H:L * H], (1, 0, 2))       # (B, T, H)
    h_n = jnp.stack([hN_wide[l, :B, l * H:(l + 1) * H] for l in range(L)], axis=0)
    c_n = jnp.stack([cN_wide[l, :B, l * H:(l + 1) * H] for l in range(L)], axis=0)
    return lstm_out, (h_n, c_n)


def init_lstm_params(key, input_size, hidden_size, num_layers):
    """Deterministic init matching PyTorch nn.LSTM parameter shapes.

    Per layer l: weight_ih (4H, F_l), weight_hh (4H, H), bias_ih (4H,), bias_hh (4H,)
    with F_0 = input_size, F_l = hidden_size for l > 0. Uniform(-1/sqrt(H), 1/sqrt(H)).
    """
    params = []
    bound = 1.0 / math.sqrt(hidden_size)
    for layer in range(num_layers):
        f_in = input_size if layer == 0 else hidden_size
        key, k1, k2, k3, k4 = jax.random.split(key, 5)
        w_ih = jax.random.uniform(k1, (4 * hidden_size, f_in), jnp.float32, -bound, bound)
        w_hh = jax.random.uniform(k2, (4 * hidden_size, hidden_size), jnp.float32, -bound, bound)
        b_ih = jax.random.uniform(k3, (4 * hidden_size,), jnp.float32, -bound, bound)
        b_hh = jax.random.uniform(k4, (4 * hidden_size,), jnp.float32, -bound, bound)
        params.append((w_ih, w_hh, b_ih, b_hh))
    return params


def _reference_lstm(x, params):
    """Pure-JAX reference (lax.scan, PyTorch gate order) for a sanity check."""
    x_tm = jnp.transpose(x, (1, 0, 2))
    h_fs, c_fs = [], []
    cur = x_tm
    for (w_ih, w_hh, b_ih, b_hh) in params:
        H = w_hh.shape[1]
        B = cur.shape[1]

        def step(carry, x_t):
            h, c = carry
            gates = x_t @ w_ih.T + b_ih + h @ w_hh.T + b_hh
            i = jax.nn.sigmoid(gates[:, 0 * H:1 * H])
            f = jax.nn.sigmoid(gates[:, 1 * H:2 * H])
            g = jnp.tanh(gates[:, 2 * H:3 * H])
            o = jax.nn.sigmoid(gates[:, 3 * H:4 * H])
            c = f * c + i * g
            h = o * jnp.tanh(c)
            return (h, c), h

        init = (jnp.zeros((B, H), jnp.float32), jnp.zeros((B, H), jnp.float32))
        (h_n, c_n), ys = jax.lax.scan(step, init, cur)
        cur = ys
        h_fs.append(h_n)
        c_fs.append(c_n)
    return jnp.transpose(cur, (1, 0, 2)), (jnp.stack(h_fs), jnp.stack(c_fs))


if __name__ == "__main__":
    # Small shapes consistent with the module's forward:
    # batch=2, seq=8, input_size=16, hidden_size=32, num_layers=4.
    B, T, INPUT_SIZE, HIDDEN_SIZE, NUM_LAYERS = 2, 8, 16, 32, 4

    key = jax.random.PRNGKey(0)
    key, xk, pk = jax.random.split(key, 3)
    x = jax.random.normal(xk, (B, T, INPUT_SIZE), jnp.float32)

    params = init_lstm_params(pk, INPUT_SIZE, HIDDEN_SIZE, NUM_LAYERS)
    params_flat = tuple(tuple(p) for p in params)

    lstm_out, (h_n, c_n) = lstm_encoder_forward(x, params_flat)
    jax.block_until_ready((lstm_out, h_n, c_n))

    # Sanity check against a pure-JAX reference.
    ref_out, (ref_h, ref_c) = _reference_lstm(x, params)
    assert lstm_out.shape == (B, T, HIDDEN_SIZE)
    assert h_n.shape == (NUM_LAYERS, B, HIDDEN_SIZE)
    assert c_n.shape == (NUM_LAYERS, B, HIDDEN_SIZE)
    assert jnp.allclose(lstm_out, ref_out, atol=1e-4, rtol=1e-4)
    assert jnp.allclose(h_n, ref_h, atol=1e-4, rtol=1e-4)
    assert jnp.allclose(c_n, ref_c, atol=1e-4, rtol=1e-4)

    print("KERNEL_OK")
</pallas_src>

<mosaic_0001>
module attributes {stable_mosaic.version = 11 : i64} {
  func.func @_wavefront_lstm_kernel(%arg0: memref<64x16xf32, #tpu.memory_space<vmem>>, %arg1: memref<16x512xf32, #tpu.memory_space<vmem>>, %arg2: memref<128x512xf32, #tpu.memory_space<vmem>>, %arg3: memref<1x512xf32, #tpu.memory_space<vmem>>, %arg4: memref<64x128xf32, #tpu.memory_space<vmem>>, %arg5: memref<4x8x128xf32, #tpu.memory_space<vmem>>, %arg6: memref<4x8x128xf32, #tpu.memory_space<vmem>>, %arg7: memref<64x512xf32, #tpu.memory_space<vmem>>) attributes {dimension_semantics = [], scalar_prefetch = 0 : i64, scratch_operands = 1 : i64, tpu.core_type = #tpu.core_type<tc>} {
    %c0 = arith.constant 0 : index
    %c0_0 = arith.constant 0 : index
    %0 = vector.load %arg0[%c0, %c0_0] : memref<64x16xf32, #tpu.memory_space<vmem>>, vector<64x16xf32>
    %c0_1 = arith.constant 0 : index
    %c0_2 = arith.constant 0 : index
    %1 = vector.load %arg1[%c0_1, %c0_2] : memref<16x512xf32, #tpu.memory_space<vmem>>, vector<16x512xf32>
    %cst = arith.constant dense<0.000000e+00> : vector<64x512xf32>
    %2 = tpu.matmul %0, %1, %cst {dimension_numbers = #tpu.dot_dimension_numbers<[1], [0], [0], [1], [0, 0, 1, 1], [], []>} : vector<64x16xf32>, vector<16x512xf32>, vector<64x512xf32> -> vector<64x512xf32>
    %c0_3 = arith.constant 0 : index
    %c0_4 = arith.constant 0 : index
    %3 = vector.load %arg3[%c0_3, %c0_4] : memref<1x512xf32, #tpu.memory_space<vmem>>, vector<1x512xf32>
    %4 = vector.broadcast %3 : vector<1x512xf32> to vector<64x512xf32>
    %5 = arith.addf %2, %4 : vector<64x512xf32>
    %c0_5 = arith.constant 0 : index
    %c0_6 = arith.constant 0 : index
    %6 = vector.load %arg7[%c0_5, %c0_6] : memref<64x512xf32, #tpu.memory_space<vmem>>, vector<64x512xf32>
    tpu.vector_store %arg7[%c0_5, %c0_6], %5 {strides = array<i32>} : memref<64x512xf32, #tpu.memory_space<vmem>>, vector<64x512xf32>,
    %c0_7 = arith.constant 0 : index
    %c0_8 = arith.constant 0 : index
    %7 = vector.load %arg2[%c0_7, %c0_8] : memref<128x512xf32, #tpu.memory_space<vmem>>, vector<128x512xf32>
    %c0_9 = arith.constant 0 : index
    %c0_10 = arith.constant 0 : index
    %8 = vector.load %arg3[%c0_9, %c0_10] : memref<1x512xf32, #tpu.memory_space<vmem>>, vector<1x512xf32>
    %9 = vector.shape_cast %8 : vector<1x512xf32> to vector<1x512xf32>
    %10 = vector.broadcast %9 : vector<1x512xf32> to vector<8x512xf32>
    %11 = tpu.iota {dimensions = array<i32: 1>} : vector<8x128xi32>
    %cst_11 = arith.constant 0.000000e+00 : f32
    %12 = vector.broadcast %cst_11 : f32 to vector<8x128xf32>
    %cst_12 = arith.constant 0.000000e+00 : f32
    %13 = vector.broadcast %cst_12 : f32 to vector<8x128xf32>
    %c0_13 = arith.constant 0 : index
    %c0_14 = arith.constant 0 : index
    %14 = vector.load %arg7[%c0_13, %c0_14] : memref<64x512xf32, #tpu.memory_space<vmem>>, vector<8x512xf32>
    %cst_15 = arith.constant dense<0.000000e+00> : vector<8x512xf32>
    %15 = tpu.matmul %12, %7, %cst_15 {dimension_numbers = #tpu.dot_dimension_numbers<[1], [0], [0], [1], [0, 0, 1, 1], [], []>} : vector<8x128xf32>, vector<128x512xf32>, vector<8x512xf32> -> vector<8x512xf32>
    %16 = arith.addf %15, %14 : vector<8x512xf32>
    %17 = vector.extract_strided_slice %16 {offsets = [0, 0], sizes = [8, 384], strides = [1, 1]} : vector<8x512xf32> to vector<8x384xf32>
    %18 = arith.negf %17 : vector<8x384xf32>
    %19 = math.exp %18 : vector<8x384xf32>
    %cst_16 = arith.constant 1.000000e+00 : f32
    %20 = vector.broadcast %cst_16 : f32 to vector<8x384xf32>
    %21 = arith.addf %20, %19 : vector<8x384xf32>
    %22 = arith.divf %20, %21 : vector<8x384xf32>
    %23 = vector.extract_strided_slice %16 {offsets = [0, 384], sizes = [8, 128], strides = [1, 1]} : vector<8x512xf32> to vector<8x128xf32>
    %24 = math.tanh %23 : vector<8x128xf32>
    %25 = vector.extract_strided_slice %22 {offsets = [0, 0], sizes = [8, 128], strides = [1, 1]} : vector<8x384xf32> to vector<8x128xf32>
    %26 = vector.extract_strided_slice %22 {offsets = [0, 128], sizes = [8, 128], strides = [1, 1]} : vector<8x384xf32> to vector<8x128xf32>
    %27 = vector.extract_strided_slice %22 {offsets = [0, 256], sizes = [8, 128], strides = [1, 1]} : vector<8x384xf32> to vector<8x128xf32>
    %28 = arith.mulf %26, %13 : vector<8x128xf32>
    %29 = arith.mulf %25, %24 : vector<8x128xf32>
    %30 = arith.addf %28, %29 : vector<8x128xf32>
    %31 = math.tanh %30 : vector<8x128xf32>
    %32 = arith.mulf %27, %31 : vector<8x128xf32>
    %c32_i32 = arith.constant 32 : i32
    %33 = vector.broadcast %c32_i32 : i32 to vector<8x128xi32>
    %34 = arith.cmpi slt, %11, %33 : vector<8x128xi32>
    %cst_17 = arith.constant 0.000000e+00 : f32
    %35 = vector.broadcast %cst_17 : f32 to vector<8x128xf32>
    %36 = arith.select %34, %30, %35 : vector<8x128xi1>, vector<8x128xf32>
    %cst_18 = arith.constant 0.000000e+00 : f32
    %37 = vector.broadcast %cst_18 : f32 to vector<8x128xf32>
    %38 = arith.select %34, %32, %37 : vector<8x128xi1>, vector<8x128xf32>
    %c8 = arith.constant 8 : index
    %c0_19 = arith.constant 0 : index
    %39 = vector.load %arg7[%c8, %c0_19] : memref<64x512xf32, #tpu.memory_space<vmem>>, vector<8x512xf32>
    %cst_20 = arith.constant dense<0.000000e+00> : vector<8x512xf32>
    %40 = tpu.matmul %38, %7, %cst_20 {dimension_numbers = #tpu.dot_dimension_numbers<[1], [0], [0], [1], [0, 0, 1, 1], [], []>} : vector<8x128xf32>, vector<128x512xf32>, vector<8x512xf32> -> vector<8x512xf32>
    %41 = arith.addf %40, %39 : vector<8x512xf32>
    %42 = vector.extract_strided_slice %41 {offsets = [0, 0], sizes = [8, 384], strides = [1, 1]} : vector<8x512xf32> to vector<8x384xf32>
    %43 = arith.negf %42 : vector<8x384xf32>
    %44 = math.exp %43 : vector<8x384xf32>
    %cst_21 = arith.constant 1.000000e+00 : f32
    %45 = vector.broadcast %cst_21 : f32 to vector<8x384xf32>
    %46 = arith.addf %45, %44 : vector<8x384xf32>
    %47 = arith.divf %45, %46 : vector<8x384xf32>
    %48 = vector.extract_strided_slice %41 {offsets = [0, 384], sizes = [8, 128], strides = [1, 1]} : vector<8x512xf32> to vector<8x128xf32>
    %49 = math.tanh %48 : vector<8x128xf32>
    %50 = vector.extract_strided_slice %47 {offsets = [0, 0], sizes = [8, 128], strides = [1, 1]} : vector<8x384xf32> to vector<8x128xf32>
    %51 = vector.extract_strided_slice %47 {offsets = [0, 128], sizes = [8, 128], strides = [1, 1]} : vector<8x384xf32> to vector<8x128xf32>
    %52 = vector.extract_strided_slice %47 {offsets = [0, 256], sizes = [8, 128], strides = [1, 1]} : vector<8x384xf32> to vector<8x128xf32>
    %53 = arith.mulf %51, %36 : vector<8x128xf32>
    %54 = arith.mulf %50, %49 : vector<8x128xf32>
    %55 = arith.addf %53, %54 : vector<8x128xf32>
    %56 = math.tanh %55 : vector<8x128xf32>
    %57 = arith.mulf %52, %56 : vector<8x128xf32>
    %c64_i32 = arith.constant 64 : i32
    %58 = vector.broadcast %c64_i32 : i32 to vector<8x128xi32>
    %59 = arith.cmpi slt, %11, %58 : vector<8x128xi32>
    %cst_22 = arith.constant 0.000000e+00 : f32
    %60 = vector.broadcast %cst_22 : f32 to vector<8x128xf32>
    %61 = arith.select %59, %55, %60 : vector<8x128xi1>, vector<8x128xf32>
    %cst_23 = arith.constant 0.000000e+00 : f32
    %62 = vector.broadcast %cst_23 : f32 to vector<8x128xf32>
    %63 = arith.select %59, %57, %62 : vector<8x128xi1>, vector<8x128xf32>
    %c16 = arith.constant 16 : index
    %c0_24 = arith.constant 0 : index
    %64 = vector.load %arg7[%c16, %c0_24] : memref<64x512xf32, #tpu.memory_space<vmem>>, vector<8x512xf32>
    %cst_25 = arith.constant dense<0.000000e+00> : vector<8x512xf32>
    %65 = tpu.matmul %63, %7, %cst_25 {dimension_numbers = #tpu.dot_dimension_numbers<[1], [0], [0], [1], [0, 0, 1, 1], [], []>} : vector<8x128xf32>, vector<128x512xf32>, vector<8x512xf32> -> vector<8x512xf32>
    %66 = arith.addf %65, %64 : vector<8x512xf32>
    %67 = vector.extract_strided_slice %66 {offsets = [0, 0], sizes = [8, 384], strides = [1, 1]} : vector<8x512xf32> to vector<8x384xf32>
    %68 = arith.negf %67 : vector<8x384xf32>
    %69 = math.exp %68 : vector<8x384xf32>
    %cst_26 = arith.constant 1.000000e+00 : f32
    %70 = vector.broadcast %cst_26 : f32 to vector<8x384xf32>
    %71 = arith.addf %70, %69 : vector<8x384xf32>
    %72 = arith.divf %70, %71 : vector<8x384xf32>
    %73 = vector.extract_strided_slice %66 {offsets = [0, 384], sizes = [8, 128], strides = [1, 1]} : vector<8x512xf32> to vector<8x128xf32>
    %74 = math.tanh %73 : vector<8x128xf32>
    %75 = vector.extract_strided_slice %72 {offsets = [0, 0], sizes = [8, 128], strides = [1, 1]} : vector<8x384xf32> to vector<8x128xf32>
    %76 = vector.extract_strided_slice %72 {offsets = [0, 128], sizes = [8, 128], strides = [1, 1]} : vector<8x384xf32> to vector<8x128xf32>
    %77 = vector.extract_strided_slice %72 {offsets = [0, 256], sizes = [8, 128], strides = [1, 1]} : vector<8x384xf32> to vector<8x128xf32>
    %78 = arith.mulf %76, %61 : vector<8x128xf32>
    %79 = arith.mulf %75, %74 : vector<8x128xf32>
    %80 = arith.addf %78, %79 : vector<8x128xf32>
    %81 = math.tanh %80 : vector<8x128xf32>
    %82 = arith.mulf %77, %81 : vector<8x128xf32>
    %c96_i32 = arith.constant 96 : i32
    %83 = vector.broadcast %c96_i32 : i32 to vector<8x128xi32>
    %84 = arith.cmpi slt, %11, %83 : vector<8x128xi32>
    %cst_27 = arith.constant 0.000000e+00 : f32
    %85 = vector.broadcast %cst_27 : f32 to vector<8x128xf32>
    %86 = arith.select %84, %80, %85 : vector<8x128xi1>, vector<8x128xf32>
    %cst_28 = arith.constant 0.000000e+00 : f32
    %87 = vector.broadcast %cst_28 : f32 to vector<8x128xf32>
    %88 = arith.select %84, %82, %87 : vector<8x128xi1>, vector<8x128xf32>
    %c24 = arith.constant 24 : index
    %c0_29 = arith.constant 0 : index
    %89 = vector.load %arg7[%c24, %c0_29] : memref<64x512xf32, #tpu.memory_space<vmem>>, vector<8x512xf32>
    %cst_30 = arith.constant dense<0.000000e+00> : vector<8x512xf32>
    %90 = tpu.matmul %88, %7, %cst_30 {dimension_numbers = #tpu.dot_dimension_numbers<[1], [0], [0], [1], [0, 0, 1, 1], [], []>} : vector<8x128xf32>, vector<128x512xf32>, vector<8x512xf32> -> vector<8x512xf32>
    %91 = arith.addf %90, %89 : vector<8x512xf32>
    %92 = vector.extract_strided_slice %91 {offsets = [0, 0], sizes = [8, 384], strides = [1, 1]} : vector<8x512xf32> to vector<8x384xf32>
    %93 = arith.negf %92 : vector<8x384xf32>
    %94 = math.exp %93 : vector<8x384xf32>
    %cst_31 = arith.constant 1.000000e+00 : f32
    %95 = vector.broadcast %cst_31 : f32 to vector<8x384xf32>
    %96 = arith.addf %95, %94 : vector<8x384xf32>
    %97 = arith.divf %95, %96 : vector<8x384xf32>
    %98 = vector.extract_strided_slice %91 {offsets = [0, 384], sizes = [8, 128], strides = [1, 1]} : vector<8x512xf32> to vector<8x128xf32>
    %99 = math.tanh %98 : vector<8x128xf32>
    %100 = vector.extract_strided_slice %97 {offsets = [0, 0], sizes = [8, 128], strides = [1, 1]} : vector<8x384xf32> to vector<8x128xf32>
    %101 = vector.extract_strided_slice %97 {offsets = [0, 128], sizes = [8, 128], strides = [1, 1]} : vector<8x384xf32> to vector<8x128xf32>
    %102 = vector.extract_strided_slice %97 {offsets = [0, 256], sizes = [8, 128], strides = [1, 1]} : vector<8x384xf32> to vector<8x128xf32>
    %103 = arith.mulf %101, %86 : vector<8x128xf32>
    %104 = arith.mulf %100, %99 : vector<8x128xf32>
    %105 = arith.addf %103, %104 : vector<8x128xf32>
    %106 = math.tanh %105 : vector<8x128xf32>
    %107 = arith.mulf %102, %106 : vector<8x128xf32>
    %c0_32 = arith.constant 0 : index
    %c0_33 = arith.constant 0 : index
    %108 = vector.load %arg4[%c0_32, %c0_33] : memref<64x128xf32, #tpu.memory_space<vmem>>, vector<8x128xf32>
    tpu.vector_store %arg4[%c0_32, %c0_33], %107 {strides = array<i32>} : memref<64x128xf32, #tpu.memory_space<vmem>>, vector<8x128xf32>,
    %c32 = arith.constant 32 : index
    %c0_34 = arith.constant 0 : index
    %109 = vector.load %arg7[%c32, %c0_34] : memref<64x512xf32, #tpu.memory_space<vmem>>, vector<8x512xf32>
    %cst_35 = arith.constant dense<0.000000e+00> : vector<8x512xf32>
    %110 = tpu.matmul %107, %7, %cst_35 {dimension_numbers = #tpu.dot_dimension_numbers<[1], [0], [0], [1], [0, 0, 1, 1], [], []>} : vector<8x128xf32>, vector<128x512xf32>, vector<8x512xf32> -> vector<8x512xf32>
    %111 = arith.addf %110, %109 : vector<8x512xf32>
    %112 = vector.extract_strided_slice %111 {offsets = [0, 0], sizes = [8, 384], strides = [1, 1]} : vector<8x512xf32> to vector<8x384xf32>
    %113 = arith.negf %112 : vector<8x384xf32>
    %114 = math.exp %113 : vector<8x384xf32>
    %cst_36 = arith.constant 1.000000e+00 : f32
    %115 = vector.broadcast %cst_36 : f32 to vector<8x384xf32>
    %116 = arith.addf %115, %114 : vector<8x384xf32>
    %117 = arith.divf %115, %116 : vector<8x384xf32>
    %118 = vector.extract_strided_slice %111 {offsets = [0, 384], sizes = [8, 128], strides = [1, 1]} : vector<8x512xf32> to vector<8x128xf32>
    %119 = math.tanh %118 : vector<8x128xf32>
    %120 = vector.extract_strided_slice %117 {offsets = [0, 0], sizes = [8, 128], strides = [1, 1]} : vector<8x384xf32> to vector<8x128xf32>
    %121 = vector.extract_strided_slice %117 {offsets = [0, 128], sizes = [8, 128], strides = [1, 1]} : vector<8x384xf32> to vector<8x128xf32>
    %122 = vector.extract_strided_slice %117 {offsets = [0, 256], sizes = [8, 128], strides = [1, 1]} : vector<8x384xf32> to vector<8x128xf32>
    %123 = arith.mulf %121, %105 : vector<8x128xf32>
    %124 = arith.mulf %120, %119 : vector<8x128xf32>
    %125 = arith.addf %123, %124 : vector<8x128xf32>
    %126 = math.tanh %125 : vector<8x128xf32>
    %127 = arith.mulf %122, %126 : vector<8x128xf32>
    %c8_37 = arith.constant 8 : index
    %c0_38 = arith.constant 0 : index
    %128 = vector.load %arg4[%c8_37, %c0_38] : memref<64x128xf32, #tpu.memory_space<vmem>>, vector<8x128xf32>
    tpu.vector_store %arg4[%c8_37, %c0_38], %127 {strides = array<i32>} : memref<64x128xf32, #tpu.memory_space<vmem>>, vector<8x128xf32>,
    %c40 = arith.constant 40 : index
    %c0_39 = arith.constant 0 : index
    %129 = vector.load %arg7[%c40, %c0_39] : memref<64x512xf32, #tpu.memory_space<vmem>>, vector<8x512xf32>
    %cst_40 = arith.constant dense<0.000000e+00> : vector<8x512xf32>
    %130 = tpu.matmul %127, %7, %cst_40 {dimension_numbers = #tpu.dot_dimension_numbers<[1], [0], [0], [1], [0, 0, 1, 1], [], []>} : vector<8x128xf32>, vector<128x512xf32>, vector<8x512xf32> -> vector<8x512xf32>
    %131 = arith.addf %130, %129 : vector<8x512xf32>
    %132 = vector.extract_strided_slice %131 {offsets = [0, 0], sizes = [8, 384], strides = [1, 1]} : vector<8x512xf32> to vector<8x384xf32>
    %133 = arith.negf %132 : vector<8x384xf32>
    %134 = math.exp %133 : vector<8x384xf32>
    %cst_41 = arith.constant 1.000000e+00 : f32
    %135 = vector.broadcast %cst_41 : f32 to vector<8x384xf32>
    %136 = arith.addf %135, %134 : vector<8x384xf32>
    %137 = arith.divf %135, %136 : vector<8x384xf32>
    %138 = vector.extract_strided_slice %131 {offsets = [0, 384], sizes = [8, 128], strides = [1, 1]} : vector<8x512xf32> to vector<8x128xf32>
    %139 = math.tanh %138 : vector<8x128xf32>
    %140 = vector.extract_strided_slice %137 {offsets = [0, 0], sizes = [8, 128], strides = [1, 1]} : vector<8x384xf32> to vector<8x128xf32>
    %141 = vector.extract_strided_slice %137 {offsets = [0, 128], sizes = [8, 128], strides = [1, 1]} : vector<8x384xf32> to vector<8x128xf32>
    %142 = vector.extract_strided_slice %137 {offsets = [0, 256], sizes = [8, 128], strides = [1, 1]} : vector<8x384xf32> to vector<8x128xf32>
    %143 = arith.mulf %141, %125 : vector<8x128xf32>
    %144 = arith.mulf %140, %139 : vector<8x128xf32>
    %145 = arith.addf %143, %144 : vector<8x128xf32>
    %146 = math.tanh %145 : vector<8x128xf32>
    %147 = arith.mulf %142, %146 : vector<8x128xf32>
    %c16_42 = arith.constant 16 : index
    %c0_43 = arith.constant 0 : index
    %148 = vector.load %arg4[%c16_42, %c0_43] : memref<64x128xf32, #tpu.memory_space<vmem>>, vector<8x128xf32>
    tpu.vector_store %arg4[%c16_42, %c0_43], %147 {strides = array<i32>} : memref<64x128xf32, #tpu.memory_space<vmem>>, vector<8x128xf32>,
    %c48 = arith.constant 48 : index
    %c0_44 = arith.constant 0 : index
    %149 = vector.load %arg7[%c48, %c0_44] : memref<64x512xf32, #tpu.memory_space<vmem>>, vector<8x512xf32>
    %cst_45 = arith.constant dense<0.000000e+00> : vector<8x512xf32>
    %150 = tpu.matmul %147, %7, %cst_45 {dimension_numbers = #tpu.dot_dimension_numbers<[1], [0], [0], [1], [0, 0, 1, 1], [], []>} : vector<8x128xf32>, vector<128x512xf32>, vector<8x512xf32> -> vector<8x512xf32>
    %151 = arith.addf %150, %149 : vector<8x512xf32>
    %152 = vector.extract_strided_slice %151 {offsets = [0, 0], sizes = [8, 384], strides = [1, 1]} : vector<8x512xf32> to vector<8x384xf32>
    %153 = arith.negf %152 : vector<8x384xf32>
    %154 = math.exp %153 : vector<8x384xf32>
    %cst_46 = arith.constant 1.000000e+00 : f32
    %155 = vector.broadcast %cst_46 : f32 to vector<8x384xf32>
    %156 = arith.addf %155, %154 : vector<8x384xf32>
    %157 = arith.divf %155, %156 : vector<8x384xf32>
    %158 = vector.extract_strided_slice %151 {offsets = [0, 384], sizes = [8, 128], strides = [1, 1]} : vector<8x512xf32> to vector<8x128xf32>
    %159 = math.tanh %158 : vector<8x128xf32>
    %160 = vector.extract_strided_slice %157 {offsets = [0, 0], sizes = [8, 128], strides = [1, 1]} : vector<8x384xf32> to vector<8x128xf32>
    %161 = vector.extract_strided_slice %157 {offsets = [0, 128], sizes = [8, 128], strides = [1, 1]} : vector<8x384xf32> to vector<8x128xf32>
    %162 = vector.extract_strided_slice %157 {offsets = [0, 256], sizes = [8, 128], strides = [1, 1]} : vector<8x384xf32> to vector<8x128xf32>
    %163 = arith.mulf %161, %145 : vector<8x128xf32>
    %164 = arith.mulf %160, %159 : vector<8x128xf32>
    %165 = arith.addf %163, %164 : vector<8x128xf32>
    %166 = math.tanh %165 : vector<8x128xf32>
    %167 = arith.mulf %162, %166 : vector<8x128xf32>
    %c24_47 = arith.constant 24 : index
    %c0_48 = arith.constant 0 : index
    %168 = vector.load %arg4[%c24_47, %c0_48] : memref<64x128xf32, #tpu.memory_space<vmem>>, vector<8x128xf32>
    tpu.vector_store %arg4[%c24_47, %c0_48], %167 {strides = array<i32>} : memref<64x128xf32, #tpu.memory_space<vmem>>, vector<8x128xf32>,
    %c56 = arith.constant 56 : index
    %c0_49 = arith.constant 0 : index
    %169 = vector.load %arg7[%c56, %c0_49] : memref<64x512xf32, #tpu.memory_space<vmem>>, vector<8x512xf32>
    %cst_50 = arith.constant dense<0.000000e+00> : vector<8x512xf32>
    %170 = tpu.matmul %167, %7, %cst_50 {dimension_numbers = #tpu.dot_dimension_numbers<[1], [0], [0], [1], [0, 0, 1, 1], [], []>} : vector<8x128xf32>, vector<128x512xf32>, vector<8x512xf32> -> vector<8x512xf32>
    %171 = arith.addf %170, %169 : vector<8x512xf32>
    %172 = vector.extract_strided_slice %171 {offsets = [0, 0], sizes = [8, 384], strides = [1, 1]} : vector<8x512xf32> to vector<8x384xf32>
    %173 = arith.negf %172 : vector<8x384xf32>
    %174 = math.exp %173 : vector<8x384xf32>
    %cst_51 = arith.constant 1.000000e+00 : f32
    %175 = vector.broadcast %cst_51 : f32 to vector<8x384xf32>
    %176 = arith.addf %175, %174 : vector<8x384xf32>
    %177 = arith.divf %175, %176 : vector<8x384xf32>
    %178 = vector.extract_strided_slice %171 {offsets = [0, 384], sizes = [8, 128], strides = [1, 1]} : vector<8x512xf32> to vector<8x128xf32>
    %179 = math.tanh %178 : vector<8x128xf32>
    %180 = vector.extract_strided_slice %177 {offsets = [0, 0], sizes = [8, 128], strides = [1, 1]} : vector<8x384xf32> to vector<8x128xf32>
    %181 = vector.extract_strided_slice %177 {offsets = [0, 128], sizes = [8, 128], strides = [1, 1]} : vector<8x384xf32> to vector<8x128xf32>
    %182 = vector.extract_strided_slice %177 {offsets = [0, 256], sizes = [8, 128], strides = [1, 1]} : vector<8x384xf32> to vector<8x128xf32>
    %183 = arith.mulf %181, %165 : vector<8x128xf32>
    %184 = arith.mulf %180, %179 : vector<8x128xf32>
    %185 = arith.addf %183, %184 : vector<8x128xf32>
    %186 = math.tanh %185 : vector<8x128xf32>
    %187 = arith.mulf %182, %186 : vector<8x128xf32>
    %c32_52 = arith.constant 32 : index
    %c0_53 = arith.constant 0 : index
    %188 = vector.load %arg4[%c32_52, %c0_53] : memref<64x128xf32, #tpu.memory_space<vmem>>, vector<8x128xf32>
    tpu.vector_store %arg4[%c32_52, %c0_53], %187 {strides = array<i32>} : memref<64x128xf32, #tpu.memory_space<vmem>>, vector<8x128xf32>,
    %c0_54 = arith.constant 0 : index
    %c0_55 = arith.constant 0 : index
    %c0_56 = arith.constant 0 : index
    %189 = vector.load %arg5[%c0_54, %c0_55, %c0_56] : memref<4x8x128xf32, #tpu.memory_space<vmem>>, vector<1x8x128xf32>
    %190 = vector.shape_cast %189 : vector<1x8x128xf32> to vector<8x128xf32>
    %191 = vector.shape_cast %187 : vector<8x128xf32> to vector<1x8x128xf32>
    tpu.vector_store %arg5[%c0_54, %c0_55, %c0_56], %191 {strides = array<i32>} : memref<4x8x128xf32, #tpu.memory_space<vmem>>, vector<1x8x128xf32>,
    %c0_57 = arith.constant 0 : index
    %c0_58 = arith.constant 0 : index
    %c0_59 = arith.constant 0 : index
    %192 = vector.load %arg6[%c0_57, %c0_58, %c0_59] : memref<4x8x128xf32, #tpu.memory_space<vmem>>, vector<1x8x128xf32>
    %193 = vector.shape_cast %192 : vector<1x8x128xf32> to vector<8x128xf32>
    %194 = vector.shape_cast %185 : vector<8x128xf32> to vector<1x8x128xf32>
    tpu.vector_store %arg6[%c0_57, %c0_58, %c0_59], %194 {strides = array<i32>} : memref<4x8x128xf32, #tpu.memory_space<vmem>>, vector<1x8x128xf32>,
    %cst_60 = arith.constant dense<0.000000e+00> : vector<8x512xf32>
    %195 = tpu.matmul %187, %7, %cst_60 {dimension_numbers = #tpu.dot_dimension_numbers<[1], [0], [0], [1], [0, 0, 1, 1], [], []>} : vector<8x128xf32>, vector<128x512xf32>, vector<8x512xf32> -> vector<8x512xf32>
    %196 = arith.addf %195, %10 : vector<8x512xf32>
    %197 = vector.extract_strided_slice %196 {offsets = [0, 0], sizes = [8, 384], strides = [1, 1]} : vector<8x512xf32> to vector<8x384xf32>
    %198 = arith.negf %197 : vector<8x384xf32>
    %199 = math.exp %198 : vector<8x384xf32>
    %cst_61 = arith.constant 1.000000e+00 : f32
    %200 = vector.broadcast %cst_61 : f32 to vector<8x384xf32>
    %201 = arith.addf %200, %199 : vector<8x384xf32>
    %202 = arith.divf %200, %201 : vector<8x384xf32>
    %203 = vector.extract_strided_slice %196 {offsets = [0, 384], sizes = [8, 128], strides = [1, 1]} : vector<8x512xf32> to vector<8x128xf32>
    %204 = math.tanh %203 : vector<8x128xf32>
    %205 = vector.extract_strided_slice %202 {offsets = [0, 0], sizes = [8, 128], strides = [1, 1]} : vector<8x384xf32> to vector<8x128xf32>
    %206 = vector.extract_strided_slice %202 {offsets = [0, 128], sizes = [8, 128], strides = [1, 1]} : vector<8x384xf32> to vector<8x128xf32>
    %207 = vector.extract_strided_slice %202 {offsets = [0, 256], sizes = [8, 128], strides = [1, 1]} : vector<8x384xf32> to vector<8x128xf32>
    %208 = arith.mulf %206, %185 : vector<8x128xf32>
    %209 = arith.mulf %205, %204 : vector<8x128xf32>
    %210 = arith.addf %208, %209 : vector<8x128xf32>
    %211 = math.tanh %210 : vector<8x128xf32>
    %212 = arith.mulf %207, %211 : vector<8x128xf32>
    %c40_62 = arith.constant 40 : index
    %c0_63 = arith.constant 0 : index
    %213 = vector.load %arg4[%c40_62, %c0_63] : memref<64x128xf32, #tpu.memory_space<vmem>>, vector<8x128xf32>
    tpu.vector_store %arg4[%c40_62, %c0_63], %212 {strides = array<i32>} : memref<64x128xf32, #tpu.memory_space<vmem>>, vector<8x128xf32>,
    %c1 = arith.constant 1 : index
    %c0_64 = arith.constant 0 : index
    %c0_65 = arith.constant 0 : index
    %214 = vector.load %arg5[%c1, %c0_64, %c0_65] : memref<4x8x128xf32, #tpu.memory_space<vmem>>, vector<1x8x128xf32>
    %215 = vector.shape_cast %214 : vector<1x8x128xf32> to vector<8x128xf32>
    %216 = vector.shape_cast %212 : vector<8x128xf32> to vector<1x8x128xf32>
    tpu.vector_store %arg5[%c1, %c0_64, %c0_65], %216 {strides = array<i32>} : memref<4x8x128xf32, #tpu.memory_space<vmem>>, vector<1x8x128xf32>,
    %c1_66 = arith.constant 1 : index
    %c0_67 = arith.constant 0 : index
    %c0_68 = arith.constant 0 : index
    %217 = vector.load %arg6[%c1_66, %c0_67, %c0_68] : memref<4x8x128xf32, #tpu.memory_space<vmem>>, vector<1x8x128xf32>
    %218 = vector.shape_cast %217 : vector<1x8x128xf32> to vector<8x128xf32>
    %219 = vector.shape_cast %210 : vector<8x128xf32> to vector<1x8x128xf32>
    tpu.vector_store %arg6[%c1_66, %c0_67, %c0_68], %219 {strides = array<i32>} : memref<4x8x128xf32, #tpu.memory_space<vmem>>, vector<1x8x128xf32>,
    %cst_69 = arith.constant dense<0.000000e+00> : vector<8x512xf32>
    %220 = tpu.matmul %212, %7, %cst_69 {dimension_numbers = #tpu.dot_dimension_numbers<[1], [0], [0], [1], [0, 0, 1, 1], [], []>} : vector<8x128xf32>, vector<128x512xf32>, vector<8x512xf32> -> vector<8x512xf32>
    %221 = arith.addf %220, %10 : vector<8x512xf32>
    %222 = vector.extract_strided_slice %221 {offsets = [0, 0], sizes = [8, 384], strides = [1, 1]} : vector<8x512xf32> to vector<8x384xf32>
    %223 = arith.negf %222 : vector<8x384xf32>
    %224 = math.exp %223 : vector<8x384xf32>
    %cst_70 = arith.constant 1.000000e+00 : f32
    %225 = vector.broadcast %cst_70 : f32 to vector<8x384xf32>
    %226 = arith.addf %225, %224 : vector<8x384xf32>
    %227 = arith.divf %225, %226 : vector<8x384xf32>
    %228 = vector.extract_strided_slice %221 {offsets = [0, 384], sizes = [8, 128], strides = [1, 1]} : vector<8x512xf32> to vector<8x128xf32>
    %229 = math.tanh %228 : vector<8x128xf32>
    %230 = vector.extract_strided_slice %227 {offsets = [0, 0], sizes = [8, 128], strides = [1, 1]} : vector<8x384xf32> to vector<8x128xf32>
    %231 = vector.extract_strided_slice %227 {offsets = [0, 128], sizes = [8, 128], strides = [1, 1]} : vector<8x384xf32> to vector<8x128xf32>
    %232 = vector.extract_strided_slice %227 {offsets = [0, 256], sizes = [8, 128], strides = [1, 1]} : vector<8x384xf32> to vector<8x128xf32>
    %233 = arith.mulf %231, %210 : vector<8x128xf32>
    %234 = arith.mulf %230, %229 : vector<8x128xf32>
    %235 = arith.addf %233, %234 : vector<8x128xf32>
    %236 = math.tanh %235 : vector<8x128xf32>
    %237 = arith.mulf %232, %236 : vector<8x128xf32>
    %c48_71 = arith.constant 48 : index
    %c0_72 = arith.constant 0 : index
    %238 = vector.load %arg4[%c48_71, %c0_72] : memref<64x128xf32, #tpu.memory_space<vmem>>, vector<8x128xf32>
    tpu.vector_store %arg4[%c48_71, %c0_72], %237 {strides = array<i32>} : memref<64x128xf32, #tpu.memory_space<vmem>>, vector<8x128xf32>,
    %c2 = arith.constant 2 : index
    %c0_73 = arith.constant 0 : index
    %c0_74 = arith.constant 0 : index
    %239 = vector.load %arg5[%c2, %c0_73, %c0_74] : memref<4x8x128xf32, #tpu.memory_space<vmem>>, vector<1x8x128xf32>
    %240 = vector.shape_cast %239 : vector<1x8x128xf32> to vector<8x128xf32>
    %241 = vector.shape_cast %237 : vector<8x128xf32> to vector<1x8x128xf32>
    tpu.vector_store %arg5[%c2, %c0_73, %c0_74], %241 {strides = array<i32>} : memref<4x8x128xf32, #tpu.memory_space<vmem>>, vector<1x8x128xf32>,
    %c2_75 = arith.constant 2 : index
    %c0_76 = arith.constant 0 : index
    %c0_77 = arith.constant 0 : index
    %242 = vector.load %arg6[%c2_75, %c0_76, %c0_77] : memref<4x8x128xf32, #tpu.memory_space<vmem>>, vector<1x8x128xf32>
    %243 = vector.shape_cast %242 : vector<1x8x128xf32> to vector<8x128xf32>
    %244 = vector.shape_cast %235 : vector<8x128xf32> to vector<1x8x128xf32>
    tpu.vector_store %arg6[%c2_75, %c0_76, %c0_77], %244 {strides = array<i32>} : memref<4x8x128xf32, #tpu.memory_space<vmem>>, vector<1x8x128xf32>,
    %cst_78 = arith.constant dense<0.000000e+00> : vector<8x512xf32>
    %245 = tpu.matmul %237, %7, %cst_78 {dimension_numbers = #tpu.dot_dimension_numbers<[1], [0], [0], [1], [0, 0, 1, 1], [], []>} : vector<8x128xf32>, vector<128x512xf32>, vector<8x512xf32> -> vector<8x512xf32>
    %246 = arith.addf %245, %10 : vector<8x512xf32>
    %247 = vector.extract_strided_slice %246 {offsets = [0, 0], sizes = [8, 384], strides = [1, 1]} : vector<8x512xf32> to vector<8x384xf32>
    %248 = arith.negf %247 : vector<8x384xf32>
    %249 = math.exp %248 : vector<8x384xf32>
    %cst_79 = arith.constant 1.000000e+00 : f32
    %250 = vector.broadcast %cst_79 : f32 to vector<8x384xf32>
    %251 = arith.addf %250, %249 : vector<8x384xf32>
    %252 = arith.divf %250, %251 : vector<8x384xf32>
    %253 = vector.extract_strided_slice %246 {offsets = [0, 384], sizes = [8, 128], strides = [1, 1]} : vector<8x512xf32> to vector<8x128xf32>
    %254 = math.tanh %253 : vector<8x128xf32>
    %255 = vector.extract_strided_slice %252 {offsets = [0, 0], sizes = [8, 128], strides = [1, 1]} : vector<8x384xf32> to vector<8x128xf32>
    %256 = vector.extract_strided_slice %252 {offsets = [0, 128], sizes = [8, 128], strides = [1, 1]} : vector<8x384xf32> to vector<8x128xf32>
    %257 = vector.extract_strided_slice %252 {offsets = [0, 256], sizes = [8, 128], strides = [1, 1]} : vector<8x384xf32> to vector<8x128xf32>
    %258 = arith.mulf %256, %235 : vector<8x128xf32>
    %259 = arith.mulf %255, %254 : vector<8x128xf32>
    %260 = arith.addf %258, %259 : vector<8x128xf32>
    %261 = math.tanh %260 : vector<8x128xf32>
    %262 = arith.mulf %257, %261 : vector<8x128xf32>
    %c56_80 = arith.constant 56 : index
    %c0_81 = arith.constant 0 : index
    %263 = vector.load %arg4[%c56_80, %c0_81] : memref<64x128xf32, #tpu.memory_space<vmem>>, vector<8x128xf32>
    tpu.vector_store %arg4[%c56_80, %c0_81], %262 {strides = array<i32>} : memref<64x128xf32, #tpu.memory_space<vmem>>, vector<8x128xf32>,
    %c3 = arith.constant 3 : index
    %c0_82 = arith.constant 0 : index
    %c0_83 = arith.constant 0 : index
    %264 = vector.load %arg5[%c3, %c0_82, %c0_83] : memref<4x8x128xf32, #tpu.memory_space<vmem>>, vector<1x8x128xf32>
    %265 = vector.shape_cast %264 : vector<1x8x128xf32> to vector<8x128xf32>
    %266 = vector.shape_cast %262 : vector<8x128xf32> to vector<1x8x128xf32>
    tpu.vector_store %arg5[%c3, %c0_82, %c0_83], %266 {strides = array<i32>} : memref<4x8x128xf32, #tpu.memory_space<vmem>>, vector<1x8x128xf32>,
    %c3_84 = arith.constant 3 : index
    %c0_85 = arith.constant 0 : index
    %c0_86 = arith.constant 0 : index
    %267 = vector.load %arg6[%c3_84, %c0_85, %c0_86] : memref<4x8x128xf32, #tpu.memory_space<vmem>>, vector<1x8x128xf32>
    %268 = vector.shape_cast %267 : vector<1x8x128xf32> to vector<8x128xf32>
    %269 = vector.shape_cast %260 : vector<8x128xf32> to vector<1x8x128xf32>
    tpu.vector_store %arg6[%c3_84, %c0_85, %c0_86], %269 {strides = array<i32>} : memref<4x8x128xf32, #tpu.memory_space<vmem>>, vector<1x8x128xf32>,
    return
  }
}

</mosaic_0001>

<bundles_post_ra>
// kernel: lstm_encoder_forward.1
= control target key start
LH: loop header
LB: loop body
LE: loop exit
PB: predicated region body
PF: predicated region fallthrough
CT: control target
= control target key end

     0   :  { %v3344_v3 = vmov 0.0   ;;  %vm58_vm0 = vcmask 130048   ;;  %s4268_s1 = inlined_call_operand.vmem [shape: f32[16,512], index: 1, kind: input, shape index: {}]   ;;  %s4269_s0 = inlined_call_operand.vmem [shape: f32[64,16], index: 0, kind: input, shape index: {}]   ;;  %s4270_s2 = inlined_call_operand.vmem [shape: f32[128,512], index: 2, kind: input, shape index: {}]   ;;  %s4271_s3 = inlined_call_operand.vmem [shape: f32[1,512], index: 3, kind: input, shape index: {}]   ;;  %s4272_s4 = inlined_call_operand.vmem [shape: f32[64,128], index: 4, kind: output, shape index: {0}]   ;;  %s4273_s6 = inlined_call_operand.vmem [shape: f32[4,8,128], index: 6, kind: output, shape index: {2}]   ;;  %s4274_s5 = inlined_call_operand.vmem [shape: f32[4,8,128], index: 5, kind: output, shape index: {1}]  }
   0x1   :  { %v29_v0 = vld [vmem:[%s4268_s1 + $0x8] sm:$0xff]  ;;  %v31_v2 = vld [vmem:[%s4268_s1 + $0x18] sm:$0xff]  ;;  %147 = vmatprep.mubr.f32.mxu0 %v3344_v3  ;;  %260 = vmatprep.mubr.f32.mxu1 %v3344_v3  ;;  %v28_v6 = vld [vmem:[%s4268_s1] sm:$0xff] }
   0x2   :  { %v33_v1 = vld [vmem:[%s4268_s1 + $0x28] sm:$0xff]  ;;  %v35_v5 = vld [vmem:[%s4268_s1 + $0x38] sm:$0xff]  ;;  %v32_v7 = vld [vmem:[%s4268_s1 + $0x20] sm:$0xff] }
   0x3   :  { %v2391_v4 = vpack.c.bf16 %v33_v1, %v29_v0  ;;  %v2395_v8 = vpack.c.bf16 %v35_v5, %v31_v2  ;;  %v2393_v9 = vpack.c.bf16 %v32_v7, %v28_v6  ;;  %v30_v10 = vld [vmem:[%s4268_s1 + $0x10] sm:$0xff]  ;;  %v20_v12 = vld [vmem:[%s4269_s0] sm:$0xff]  ;;  %v342_v14 = vld [vmem:[%s4270_s2 + $0x8] sm:$0xff] }
   0x4   :  { %v34_v11 = vld [vmem:[%s4268_s1 + $0x30] sm:$0xff]  ;;  %v346_v15 = vld [vmem:[%s4270_s2 + $0x28] sm:$0xff]  ;;  %v344_v16 = vld [vmem:[%s4270_s2 + $0x18] sm:$0xff] }
   0x5   :  { %2392 = vmatprep.subr.bf16.mxu0 %v2391_v4  ;;  %v2397_v13 = vpack.c.bf16 %v34_v11, %v30_v10  ;;  %2396 = vmatprep.subr.bf16.mxu1 %v2395_v8  ;;  %v3418_v17 = vpack.c.bf16 %v346_v15, %v342_v14  ;;  %v348_v18 = vld [vmem:[%s4270_s2 + $0x38] sm:$0xff]  ;;  %v341_v19 = vld [vmem:[%s4270_s2] sm:$0xff]  ;;  %v343_v23 = vld [vmem:[%s4270_s2 + $0x10] sm:$0xff] }
   0x6   :  { %2394 = vmatpush1.bf16.msra.mxu0 %v2393_v9  ;;  %v345_v20 = vld [vmem:[%s4270_s2 + $0x20] sm:$0xff]  ;;  %v3429_v21 = vpack.c.bf16 %v348_v18, %v344_v16  ;;  %v347_v24 = vld [vmem:[%s4270_s2 + $0x30] sm:$0xff]  ;;  %v350_v26 = vld [vmem:[%s4270_s2 + $0x48] sm:$0xff] }
   0x7   :  { %2398 = vmatpush1.bf16.msra.mxu1 %v2397_v13  ;;  %v3431_v22 = vpack.c.bf16 %v345_v20, %v341_v19  ;;  %2400 = vmatprep.subr.bf16.mxu0 %v3418_v17  ;;  %v3440_v25 = vpack.c.bf16 %v347_v24, %v343_v23  ;;  %v354_v27 = vld [vmem:[%s4270_s2 + $0x68] sm:$0xff]  ;;  %v352_v28 = vld [vmem:[%s4270_s2 + $0x58] sm:$0xff]  ;;  %v349_v31 = vld [vmem:[%s4270_s2 + $0x40] sm:$0xff] }
   0x8   :  { %2432 = vmatprep.subr.bf16.mxu1 %v3429_v21  ;;  %v3453_v29 = vpack.c.bf16 %v354_v27, %v350_v26  ;;  %v356_v30 = vld [vmem:[%s4270_s2 + $0x78] sm:$0xff]  ;;  %v353_v32 = vld [vmem:[%s4270_s2 + $0x60] sm:$0xff]  ;;  %v21_v33 = vld [vmem:[%s4269_s0 + $0x8] sm:$0xff] }
   0x9   :  { %2330 = vmatmul.mubr.msk.f32.vlgmr.msra.gmra.mrb[0].mxu0 %vm58_vm0, %v20_v12  ;;  %v3469_v34 = vpack.c.bf16 %v356_v30, %v352_v28  ;;  %v3471_v35 = vpack.c.bf16 %v353_v32, %v349_v31  ;;  %v351_v36 = vld [vmem:[%s4270_s2 + $0x50] sm:$0xff]  ;;  %v358_v39 = vld [vmem:[%s4270_s2 + $0x88] sm:$0xff]  ;;  %v360_v41 = vld [vmem:[%s4270_s2 + $0x98] sm:$0xff] }
   0xa   :  { %2338 = vmatmul.mubr.msk.f32.vlgmr.msra.gmra.mrb[0].mxu1 %vm58_vm0, %v20_v12  ;;  %2402 = vmatpush1.bf16.msra.mxu0 %v3431_v22  ;;  %v355_v37 = vld [vmem:[%s4270_s2 + $0x70] sm:$0xff]  ;;  %v362_v40 = vld [vmem:[%s4270_s2 + $0xa8] sm:$0xff]  ;;  %v364_v43 = vld [vmem:[%s4270_s2 + $0xb8] sm:$0xff] }
   0xb   :  { %2434 = vmatpush1.bf16.msra.mxu1 %v3440_v25  ;;  %153 = vmatprep.mubr.f32.mxu0 %v3344_v3  ;;  %v3481_v38 = vpack.c.bf16 %v355_v37, %v351_v36  ;;  %v3494_v42 = vpack.c.bf16 %v362_v40, %v358_v39  ;;  %v357_v44 = vld [vmem:[%s4270_s2 + $0x80] sm:$0xff]  ;;  %v22_v46 = vld [vmem:[%s4269_s0 + $0x10] sm:$0xff]  ;;  %v3510_v47 = vpack.c.bf16 %v364_v43, %v360_v41  ;;  %v366_v51 = vld [vmem:[%s4270_s2 + $0xc8] sm:$0xff] }
   0xc   :  { %266 = vmatprep.mubr.f32.mxu1 %v3344_v3  ;;  %2404 = vmatprep.subr.bf16.mxu0 %v3453_v29  ;;  %v361_v45 = vld [vmem:[%s4270_s2 + $0xa0] sm:$0xff]  ;;  %v359_v48 = vld [vmem:[%s4270_s2 + $0x90] sm:$0xff]  ;;  %v370_v52 = vld [vmem:[%s4270_s2 + $0xe8] sm:$0xff] }
   0xd   :  { %2331 = vmatmul.mubr.msk.f32.gmra.mrb[2].mxu0 %vm58_vm0, %v21_v33  ;;  %2436 = vmatprep.subr.bf16.mxu1 %v3469_v34  ;;  %v363_v49 = vld [vmem:[%s4270_s2 + $0xb0] sm:$0xff]  ;;  %v3520_v50 = vpack.c.bf16 %v361_v45, %v357_v44  ;;  %v368_v53 = vld [vmem:[%s4270_s2 + $0xd8] sm:$0xff]  ;;  %v365_v56 = vld [vmem:[%s4270_s2 + $0xc0] sm:$0xff]  ;;  %v3546_v58 = vpack.c.bf16 %v370_v52, %v366_v51 }
   0xe   :  { %2339 = vmatmul.mubr.msk.f32.gmra.mrb[2].mxu1 %vm58_vm0, %v21_v33  ;;  %2406 = vmatpush1.bf16.msra.mxu0 %v3471_v35  ;;  %v3533_v54 = vpack.c.bf16 %v363_v49, %v359_v48  ;;  %v372_v55 = vld [vmem:[%s4270_s2 + $0xf8] sm:$0xff]  ;;  %v369_v57 = vld [vmem:[%s4270_s2 + $0xe0] sm:$0xff]  ;;  %v367_v59 = vld [vmem:[%s4270_s2 + $0xd0] sm:$0xff] }
   0xf   :  { %2438 = vmatpush1.bf16.msra.mxu1 %v3481_v38  ;;  %159 = vmatprep.mubr.f32.mxu0 %v3344_v3  ;;  %v371_v60 = vld [vmem:[%s4270_s2 + $0xf0] sm:$0xff]  ;;  %v3556_v61 = vpack.c.bf16 %v372_v55, %v368_v53  ;;  %v374_v62 = vld [vmem:[%s4270_s2 + $0x108] sm:$0xff]  ;;  %v23_v0 = vld [vmem:[%s4269_s0 + $0x18] sm:$0xff]  ;;  %v3569_v1 = vpack.c.bf16 %v369_v57, %v365_v56 }
  0x10   :  { %272 = vmatprep.mubr.f32.mxu1 %v3344_v3  ;;  %2408 = vmatprep.subr.bf16.mxu0 %v3494_v42  ;;  %v378_v63 = vld [vmem:[%s4270_s2 + $0x128] sm:$0xff]  ;;  %v376_v2 = vld [vmem:[%s4270_s2 + $0x118] sm:$0xff]  ;;  %v3579_v5 = vpack.c.bf16 %v371_v60, %v367_v59  ;;  %v373_v6 = vld [vmem:[%s4270_s2 + $0x100] sm:$0xff] }
  0x11   :  { %2332 = vmatmul.mubr.msk.f32.gmra.mrb[4].mxu0 %vm58_vm0, %v22_v46  ;;  %2440 = vmatprep.subr.bf16.mxu1 %v3510_v47  ;;  %v380_v4 = vld [vmem:[%s4270_s2 + $0x138] sm:$0xff]  ;;  %v377_v7 = vld [vmem:[%s4270_s2 + $0x120] sm:$0xff]  ;;  %v3589_v8 = vpack.c.bf16 %v378_v63, %v374_v62  ;;  %v375_v9 = vld [vmem:[%s4270_s2 + $0x110] sm:$0xff] }
  0x12   :  { %2340 = vmatmul.mubr.msk.f32.gmra.mrb[4].mxu1 %vm58_vm0, %v22_v46  ;;  %2410 = vmatpush1.bf16.msra.mxu0 %v3520_v50  ;;  %v379_v10 = vld [vmem:[%s4270_s2 + $0x130] sm:$0xff]  ;;  %v3599_v11 = vpack.c.bf16 %v380_v4, %v376_v2  ;;  %v382_v12 = vld [vmem:[%s4270_s2 + $0x148] sm:$0xff]  ;;  %v24_v14 = vld [vmem:[%s4269_s0 + $0x20] sm:$0xff]  ;;  %v3612_v15 = vpack.c.bf16 %v377_v7, %v373_v6  ;;  %v38_v7 = vlaneseq }
  0x13   :  { %2442 = vmatpush1.bf16.msra.mxu1 %v3533_v54  ;;  %165 = vmatprep.mubr.f32.mxu0 %v3344_v3  ;;  %v386_v13 = vld [vmem:[%s4270_s2 + $0x168] sm:$0xff]  ;;  %v384_v16 = vld [vmem:[%s4270_s2 + $0x158] sm:$0xff]  ;;  %v3622_v19 = vpack.c.bf16 %v379_v10, %v375_v9  ;;  %v381_v20 = vld [vmem:[%s4270_s2 + $0x140] sm:$0xff] }
  0x14   :  { %278 = vmatprep.mubr.f32.mxu1 %v3344_v3  ;;  %2412 = vmatprep.subr.bf16.mxu0 %v3546_v58  ;;  %v388_v18 = vld [vmem:[%s4270_s2 + $0x178] sm:$0xff]  ;;  %v385_v23 = vld [vmem:[%s4270_s2 + $0x160] sm:$0xff]  ;;  %v3632_v24 = vpack.c.bf16 %v386_v13, %v382_v12  ;;  %v383_v26 = vld [vmem:[%s4270_s2 + $0x150] sm:$0xff]  ;;  %v3788_v9 = vshrl.u32 %v38_v7, 7 }
  0x15   :  { %2333 = vmatmul.mubr.msk.f32.gmra.mrb[6].mxu0 %vm58_vm0, %v23_v0  ;;  %2444 = vmatprep.subr.bf16.mxu1 %v3556_v61  ;;  %v387_v27 = vld [vmem:[%s4270_s2 + $0x170] sm:$0xff]  ;;  %v3642_v28 = vpack.c.bf16 %v388_v18, %v384_v16  ;;  %v390_v30 = vld [vmem:[%s4270_s2 + $0x188] sm:$0xff]  ;;  %v3655_v33 = vpack.c.bf16 %v385_v23, %v381_v20  ;;  %v392_v36 = vld [vmem:[%s4270_s2 + $0x198] sm:$0xff] }
  0x16   :  { %2341 = vmatmul.mubr.msk.f32.gmra.mrb[6].mxu1 %vm58_vm0, %v23_v0  ;;  %2414 = vmatpush1.bf16.msra.mxu0 %v3569_v1  ;;  %v394_v31 = vld [vmem:[%s4270_s2 + $0x1a8] sm:$0xff]  ;;  %v396_v37 = vld [vmem:[%s4270_s2 + $0x1b8] sm:$0xff]  ;;  %v3665_v39 = vpack.c.bf16 %v387_v27, %v383_v26  ;;  %v389_v40 = vld [vmem:[%s4270_s2 + $0x180] sm:$0xff]  ;;  %v40_v10 = vsub.s32 0, %v3788_v9  ;;  %v44_v13 = vsub.s32 1, %v3788_v9  ;;  %v48_v20 = vsub.s32 2, %v3788_v9 }
  0x17   :  { %2446 = vmatpush1.bf16.msra.mxu1 %v3579_v5  ;;  %171 = vmatprep.mubr.f32.mxu0 %v3344_v3  ;;  %v25_v32 = vld [vmem:[%s4269_s0 + $0x28] sm:$0xff]  ;;  %v393_v41 = vld [vmem:[%s4270_s2 + $0x1a0] sm:$0xff]  ;;  %v3675_v43 = vpack.c.bf16 %v394_v31, %v390_v30  ;;  %v391_v44 = vld [vmem:[%s4270_s2 + $0x190] sm:$0xff]  ;;  %v3685_v46 = vpack.c.bf16 %v396_v37, %v392_v36 }
  0x18   :  { %284 = vmatprep.mubr.f32.mxu1 %v3344_v3  ;;  %2416 = vmatprep.subr.bf16.mxu0 %v3589_v8  ;;  %v395_v45 = vld [vmem:[%s4270_s2 + $0x1b0] sm:$0xff]  ;;  %v398_v48 = vld [vmem:[%s4270_s2 + $0x1c8] sm:$0xff]  ;;  %v3698_v52 = vpack.c.bf16 %v393_v41, %v389_v40  ;;  %v400_v53 = vld [vmem:[%s4270_s2 + $0x1d8] sm:$0xff]  ;;  %v52_v40 = vsub.s32 3, %v3788_v9 }
  0x19   :  { %2334 = vmatmul.mubr.msk.f32.gmra.mrb[8].mxu0 %vm58_vm0, %v24_v14  ;;  %2448 = vmatprep.subr.bf16.mxu1 %v3599_v11  ;;  %v402_v49 = vld [vmem:[%s4270_s2 + $0x1e8] sm:$0xff]  ;;  %v26_v51 = vld [vmem:[%s4269_s0 + $0x30] sm:$0xff]  ;;  %v404_v55 = vld [vmem:[%s4270_s2 + $0x1f8] sm:$0xff]  ;;  %v3708_v56 = vpack.c.bf16 %v395_v45, %v391_v44 }
  0x1a   :  { %2342 = vmatmul.mubr.msk.f32.gmra.mrb[8].mxu1 %vm58_vm0, %v24_v14  ;;  %2418 = vmatpush1.bf16.msra.mxu0 %v3612_v15  ;;  %v397_v57 = vld [vmem:[%s4270_s2 + $0x1c0] sm:$0xff]  ;;  %v3718_v60 = vpack.c.bf16 %v402_v49, %v398_v48  ;;  %v399_v62 = vld [vmem:[%s4270_s2 + $0x1d0] sm:$0xff]  ;;  %v3728_v0 = vpack.c.bf16 %v404_v55, %v400_v53  ;;  %v27_v2 = vld [vmem:[%s4269_s0 + $0x38] sm:$0xff] }
  0x1b   :  { %2450 = vmatpush1.bf16.msra.mxu1 %v3622_v19  ;;  %177 = vmatprep.mubr.f32.mxu0 %v3344_v3  ;;  %v401_v59 = vld [vmem:[%s4270_s2 + $0x1e0] sm:$0xff]  ;;  %v403_v63 = vld [vmem:[%s4270_s2 + $0x1f0] sm:$0xff] }
  0x1c   :  { %290 = vmatprep.mubr.f32.mxu1 %v3344_v3  ;;  %2420 = vmatprep.subr.bf16.mxu0 %v3632_v24  ;;  %v3735_v4 = vpack.c.bf16 %v401_v59, %v397_v57  ;;  %v3739_v6 = vpack.c.bf16 %v403_v63, %v399_v62  ;;  %v36_v12 = vld [vmem:[%s4271_s3] sm:$0xf]  ;;  %v3817_v63 = vand.u32 127, %v38_v7 }
  0x1d   :  { %2335 = vmatmul.mubr.msk.f32.gmra.mrb[10].mxu0 %vm58_vm0, %v25_v32  ;;  %2452 = vmatprep.subr.bf16.mxu1 %v3642_v28  ;;  %v3797_v14 = vrot.slane %v36_v12, %v40_v10  ;;  %v3801_v16 = vrot.slane %v36_v12, %v44_v13  ;;  %v3808_v36 = vrot.slane %v36_v12, %v48_v20 }
  0x1e   :  { %2343 = vmatmul.mubr.msk.f32.gmra.mrb[10].mxu1 %vm58_vm0, %v25_v32  ;;  %2422 = vmatpush1.bf16.msra.mxu0 %v3655_v33  ;;  %v3814_v44 = vrot.slane %v36_v12, %v52_v40  ;;  %vm599_vm1 = vcmp.lt.s32.totalorder %v3817_v63, 32  ;;  %vm772_vm2 = vcmp.lt.s32.totalorder %v3817_v63, 64  ;;  %vm945_vm3 = vcmp.lt.s32.totalorder %v3817_v63, 96 }
  0x1f   :  { %2454 = vmatpush1.bf16.msra.mxu1 %v3665_v39  ;;  %183 = vmatprep.mubr.f32.mxu0 %v3344_v3 }
  0x20   :  { %296 = vmatprep.mubr.f32.mxu1 %v3344_v3  ;;  %2424 = vmatprep.subr.bf16.mxu0 %v3675_v43 }
  0x21   :  { %2336 = vmatmul.mubr.msk.f32.gmra.mrb[12].mxu0 %vm58_vm0, %v26_v51  ;;  %2456 = vmatprep.subr.bf16.mxu1 %v3685_v46 }
  0x22   :  { %2344 = vmatmul.mubr.msk.f32.gmra.mrb[12].mxu1 %vm58_vm0, %v26_v51  ;;  %2426 = vmatpush1.bf16.msra.mxu0 %v3698_v52 }
  0x23   :  { %2458 = vmatpush1.bf16.msra.mxu1 %v3708_v56  ;;  %189 = vmatprep.mubr.f32.mxu0 %v3344_v3 }
  0x24   :  { %302 = vmatprep.mubr.f32.mxu1 %v3344_v3  ;;  %2428 = vmatprep.subr.bf16.mxu0 %v3718_v60 }
  0x25   :  { %2337 = vmatmul.mubr.msk.f32.gmra.mrb[14].mxu0 %vm58_vm0, %v27_v2  ;;  %2460 = vmatprep.subr.bf16.mxu1 %v3728_v0 }
  0x26   :  { %2345 = vmatmul.mubr.msk.f32.gmra.mrb[14].mxu1 %vm58_vm0, %v27_v2  ;;  %2430 = vmatpush1.bf16.msra.mxu0 %v3735_v4 }
  0x27   :  { %2462 = vmatpush1.bf16.msra.mxu1 %v3739_v6  ;;  %497 = vmatprep.mubr.f32.mxu0 %v3344_v3 }
  0x28   :  { %568 = vmatprep.mubr.f32.mxu1 %v3344_v3  ;;  %2464 = vmatprep.subr.bf16.mxu0 %v3418_v17 }
  0x29   :  { %498 = vmatmul.mubr.f32.vlgmr.msra.gmra.mrb[0].mxu0 %v3344_v3  ;;  %2496 = vmatprep.subr.bf16.mxu1 %v3429_v21 }
  0x2a   :  { %569 = vmatmul.mubr.f32.vlgmr.msra.gmra.mrb[0].mxu1 %v3344_v3  ;;  %2466 = vmatpush1.bf16.msra.mxu0 %v3431_v22 }
  0x2b   :  { %2498 = vmatpush1.bf16.msra.mxu1 %v3440_v25  ;;  %2468 = vmatprep.subr.bf16.mxu0 %v3453_v29 }
  0x2c   :  { %2500 = vmatprep.subr.bf16.mxu1 %v3469_v34  ;;  %670 = vmatprep.mubr.f32.mxu0 %v3344_v3 }
  0x2d   :  { %741 = vmatprep.mubr.f32.mxu1 %v3344_v3 }
  0x2e   :  { %2470 = vmatpush1.bf16.msra.mxu0 %v3471_v35 }
  0x2f   :  { %2502 = vmatpush1.bf16.msra.mxu1 %v3481_v38  ;;  %2472 = vmatprep.subr.bf16.mxu0 %v3494_v42 }
  0x30   :  { %2504 = vmatprep.subr.bf16.mxu1 %v3510_v47 }
  0x32   :  { %2474 = vmatpush1.bf16.msra.mxu0 %v3520_v50 }
  0x33   :  { %2506 = vmatpush1.bf16.msra.mxu1 %v3533_v54  ;;  %2476 = vmatprep.subr.bf16.mxu0 %v3546_v58 }
  0x34   :  { %2508 = vmatprep.subr.bf16.mxu1 %v3556_v61 }
  0x36   :  { %2478 = vmatpush1.bf16.msra.mxu0 %v3569_v1 }
  0x37   :  { %2510 = vmatpush1.bf16.msra.mxu1 %v3579_v5  ;;  %2480 = vmatprep.subr.bf16.mxu0 %v3589_v8 }
  0x38   :  { %2512 = vmatprep.subr.bf16.mxu1 %v3599_v11 }
  0x3a   :  { %2482 = vmatpush1.bf16.msra.mxu0 %v3612_v15 }
  0x3b   :  { %2514 = vmatpush1.bf16.msra.mxu1 %v3622_v19  ;;  %2484 = vmatprep.subr.bf16.mxu0 %v3632_v24 }
  0x3c   :  { %2516 = vmatprep.subr.bf16.mxu1 %v3642_v28 }
  0x3e   :  { %2486 = vmatpush1.bf16.msra.mxu0 %v3655_v33 }
  0x3f   :  { %2518 = vmatpush1.bf16.msra.mxu1 %v3665_v39  ;;  %2488 = vmatprep.subr.bf16.mxu0 %v3675_v43 }
  0x40   :  { %2520 = vmatprep.subr.bf16.mxu1 %v3685_v46 }
  0x42   :  { %2490 = vmatpush1.bf16.msra.mxu0 %v3698_v52 }
  0x43   :  { %2522 = vmatpush1.bf16.msra.mxu1 %v3708_v56  ;;  %2492 = vmatprep.subr.bf16.mxu0 %v3718_v60 }
  0x44   :  { %2524 = vmatprep.subr.bf16.mxu1 %v3728_v0 }
  0x46   :  { %2494 = vmatpush1.bf16.msra.mxu0 %v3735_v4 }
  0x47   :  { %2526 = vmatpush1.bf16.msra.mxu1 %v3739_v6  ;;  %2528 = vmatprep.subr.bf16.mxu0 %v3418_v17 }
  0x48   :  { %2560 = vmatprep.subr.bf16.mxu1 %v3429_v21 }
  0xfc   :  { %v499_v18 = vpop.f32.mrb[0].mxu0 }
  0xfd   :  { %v3103_v23 = vadd.f32 %v499_v18, %v3797_v14  ;;  %v570_v26 = vpop.f32.mrb[0].mxu1  ;;  %v501_v27 = vpop.f32.mrb[1].mxu0 }
  0xfe   :  { %v3104_v30 = vadd.f32 %v501_v27, %v3801_v16  ;;  %v572_v31 = vpop.f32.mrb[1].mxu1  ;;  %v3119_v41 = vadd.f32 %v570_v26, %v3808_v36 }
  0xff   :  { %v2346_v32 = vmul.f32 -1.442695, %v3103_v23  ;;  %v3120_v48 = vadd.f32 %v572_v31, %v3814_v44 }
 0x100   :  { %v2347_v37 = vmul.f32 -1.442695, %v3104_v30  ;;  %v2348_v45 = vmul.f32 -1.442695, %v3119_v41 }
 0x101   :  { %3168 = vpow2.f32 %v2346_v32 }
 0x102   :  { %3170 = vpow2.f32 %v2347_v37 }
 0x103   :  { %3172 = vpow2.f32 %v2348_v45 }
 0x104   :  { %3174 = vtanh.f32 %v3120_v48 }
 0x10b   :  { %v3169_v49 = vpop.eup %3168 }
 0x10c   :  { %v584_v51 = vadd.f32 1.0, %v3169_v49  ;;  %v3171_v53 = vpop.eup %3170 }
 0x10d   :  { %v585_v55 = vadd.f32 1.0, %v3171_v53  ;;  %v3173_v57 = vpop.eup %3172 }
 0x10e   :  { %3176 = vrcp.f32 %v584_v51  ;;  %v3175_v59 = vpop.eup %3174  ;;  %v586_v12 = vadd.f32 1.0, %v3173_v57 }
 0x10f   :  { %3178 = vrcp.f32 %v585_v55 }
 0x110   :  { %3180 = vrcp.f32 %v586_v12 }
 0x118   :  { %v3177_v62 = vpop.eup %3176 }
 0x119   :  { %v595_v2 = vmul.f32 %v3177_v62, %v3175_v59  ;;  %v3179_v18 = vpop.eup %3178 }
 0x11a   :  { %v594_v23 = vmul.f32 0.0, %v3179_v18  ;;  %v3181_v30 = vpop.eup %3180 }
 0x11c   :  { %v596_v26 = vadd.f32 %v595_v2, %v594_v23 }
 0x11e   :  { %3182 = vtanh.f32 %v596_v26  ;;  %v3820_v27 = vsel %vm599_vm1, %v596_v26, 0.0 }
 0x128   :  { %v3183_v31 = vpop.eup %3182 }
 0x129   :  { %v598_v32 = vmul.f32 %v3183_v31, %v3181_v30 }
 0x12b   :  { %2349 = vmatmul.mubr.msk.f32.vlgmr.msra.gmra.mrb[2].mxu0 %vm599_vm1, %v598_v32  ;;  %2350 = vmatmul.mubr.msk.f32.vlgmr.msra.gmra.mrb[2].mxu1 %vm599_vm1, %v598_v32 }
 0x12c   :  { %2530 = vmatpush1.bf16.msra.mxu0 %v3431_v22  ;;  %2562 = vmatpush1.bf16.msra.mxu1 %v3440_v25 }
 0x12d   :  { %2532 = vmatprep.subr.bf16.mxu0 %v3453_v29  ;;  %2564 = vmatprep.subr.bf16.mxu1 %v3469_v34 }
 0x12e   :  { %843 = vmatprep.mubr.f32.mxu0 %v3344_v3  ;;  %914 = vmatprep.mubr.f32.mxu1 %v3344_v3 }
 0x130   :  { %2534 = vmatpush1.bf16.msra.mxu0 %v3471_v35  ;;  %2566 = vmatpush1.bf16.msra.mxu1 %v3481_v38 }
 0x131   :  { %2536 = vmatprep.subr.bf16.mxu0 %v3494_v42  ;;  %2568 = vmatprep.subr.bf16.mxu1 %v3510_v47 }
 0x134   :  { %2538 = vmatpush1.bf16.msra.mxu0 %v3520_v50  ;;  %2570 = vmatpush1.bf16.msra.mxu1 %v3533_v54 }
 0x135   :  { %2540 = vmatprep.subr.bf16.mxu0 %v3546_v58  ;;  %2572 = vmatprep.subr.bf16.mxu1 %v3556_v61 }
 0x138   :  { %2542 = vmatpush1.bf16.msra.mxu0 %v3569_v1  ;;  %2574 = vmatpush1.bf16.msra.mxu1 %v3579_v5 }
 0x139   :  { %2544 = vmatprep.subr.bf16.mxu0 %v3589_v8  ;;  %2576 = vmatprep.subr.bf16.mxu1 %v3599_v11 }
 0x13c   :  { %2546 = vmatpush1.bf16.msra.mxu0 %v3612_v15  ;;  %2578 = vmatpush1.bf16.msra.mxu1 %v3622_v19 }
 0x13d   :  { %2548 = vmatprep.subr.bf16.mxu0 %v3632_v24  ;;  %2580 = vmatprep.subr.bf16.mxu1 %v3642_v28 }
 0x140   :  { %2550 = vmatpush1.bf16.msra.mxu0 %v3655_v33  ;;  %2582 = vmatpush1.bf16.msra.mxu1 %v3665_v39 }
 0x141   :  { %2552 = vmatprep.subr.bf16.mxu0 %v3675_v43  ;;  %2584 = vmatprep.subr.bf16.mxu1 %v3685_v46 }
 0x144   :  { %2554 = vmatpush1.bf16.msra.mxu0 %v3698_v52  ;;  %2586 = vmatpush1.bf16.msra.mxu1 %v3708_v56 }
 0x145   :  { %2556 = vmatprep.subr.bf16.mxu0 %v3718_v60  ;;  %2588 = vmatprep.subr.bf16.mxu1 %v3728_v0 }
 0x148   :  { %2558 = vmatpush1.bf16.msra.mxu0 %v3735_v4  ;;  %2590 = vmatpush1.bf16.msra.mxu1 %v3739_v6 }
 0x149   :  { %2592 = vmatprep.subr.bf16.mxu0 %v3418_v17  ;;  %2624 = vmatprep.subr.bf16.mxu1 %v3429_v21 }
 0x1fe   :  { %v672_v7 = vpop.f32.mrb[2].mxu0  ;;  %v743_v37 = vpop.f32.mrb[2].mxu1 }
 0x1ff   :  { %v3105_v41 = vadd.f32 %v672_v7, %v3797_v14  ;;  %v674_v45 = vpop.f32.mrb[3].mxu0  ;;  %v745_v48 = vpop.f32.mrb[3].mxu1  ;;  %v3121_v55 = vadd.f32 %v743_v37, %v3808_v36 }
 0x200   :  { %v3106_v49 = vadd.f32 %v674_v45, %v3801_v16  ;;  %v3122_v57 = vadd.f32 %v745_v48, %v3814_v44 }
 0x201   :  { %v2351_v51 = vmul.f32 -1.442695, %v3105_v41  ;;  %v2353_v59 = vmul.f32 -1.442695, %v3121_v55 }
 0x202   :  { %v2352_v53 = vmul.f32 -1.442695, %v3106_v49 }
 0x203   :  { %3184 = vpow2.f32 %v2351_v51 }
 0x204   :  { %3186 = vpow2.f32 %v2352_v53 }
 0x205   :  { %3188 = vtanh.f32 %v3122_v57 }
 0x206   :  { %3190 = vpow2.f32 %v2353_v59 }
 0x20d   :  { %v3185_v62 = vpop.eup %3184 }
 0x20e   :  { %v757_v2 = vadd.f32 1.0, %v3185_v62  ;;  %v3187_v18 = vpop.eup %3186 }
 0x20f   :  { %v758_v12 = vadd.f32 1.0, %v3187_v18  ;;  %v3189_v23 = vpop.eup %3188 }
 0x210   :  { %3192 = vrcp.f32 %v757_v2  ;;  %v3191_v26 = vpop.eup %3190 }
 0x211   :  { %3194 = vrcp.f32 %v758_v12  ;;  %v759_v7 = vadd.f32 1.0, %v3191_v26 }
 0x213   :  { %3196 = vrcp.f32 %v759_v7 }
 0x21a   :  { %v3193_v30 = vpop.eup %3192 }
 0x21b   :  { %v768_v31 = vmul.f32 %v3193_v30, %v3189_v23  ;;  %v3195_v32 = vpop.eup %3194 }
 0x21c   :  { %v767_v41 = vmul.f32 %v3195_v32, %v3820_v27 }
 0x21d   :  { %v3197_v48 = vpop.eup %3196 }
 0x21e   :  { %v769_v37 = vadd.f32 %v768_v31, %v767_v41 }
 0x220   :  { %3198 = vtanh.f32 %v769_v37  ;;  %v3862_v45 = vsel %vm772_vm2, %v769_v37, 0.0 }
 0x22a   :  { %v3199_v49 = vpop.eup %3198 }
 0x22b   :  { %v771_v51 = vmul.f32 %v3199_v49, %v3197_v48 }
 0x22d   :  { %2354 = vmatmul.mubr.msk.f32.vlgmr.msra.gmra.mrb[4].mxu0 %vm772_vm2, %v771_v51  ;;  %2355 = vmatmul.mubr.msk.f32.vlgmr.msra.gmra.mrb[4].mxu1 %vm772_vm2, %v771_v51 }
 0x22e   :  { %2594 = vmatpush1.bf16.msra.mxu0 %v3431_v22  ;;  %2626 = vmatpush1.bf16.msra.mxu1 %v3440_v25 }
 0x22f   :  { %2596 = vmatprep.subr.bf16.mxu0 %v3453_v29  ;;  %2628 = vmatprep.subr.bf16.mxu1 %v3469_v34 }
 0x230   :  { %1016 = vmatprep.mubr.f32.mxu0 %v3344_v3  ;;  %1087 = vmatprep.mubr.f32.mxu1 %v3344_v3 }
 0x232   :  { %2598 = vmatpush1.bf16.msra.mxu0 %v3471_v35  ;;  %2630 = vmatpush1.bf16.msra.mxu1 %v3481_v38 }
 0x233   :  { %2600 = vmatprep.subr.bf16.mxu0 %v3494_v42  ;;  %2632 = vmatprep.subr.bf16.mxu1 %v3510_v47 }
 0x236   :  { %2602 = vmatpush1.bf16.msra.mxu0 %v3520_v50  ;;  %2634 = vmatpush1.bf16.msra.mxu1 %v3533_v54 }
 0x237   :  { %2604 = vmatprep.subr.bf16.mxu0 %v3546_v58  ;;  %2636 = vmatprep.subr.bf16.mxu1 %v3556_v61 }
 0x23a   :  { %2606 = vmatpush1.bf16.msra.mxu0 %v3569_v1  ;;  %2638 = vmatpush1.bf16.msra.mxu1 %v3579_v5 }
 0x23b   :  { %2608 = vmatprep.subr.bf16.mxu0 %v3589_v8  ;;  %2640 = vmatprep.subr.bf16.mxu1 %v3599_v11 }
 0x23e   :  { %2610 = vmatpush1.bf16.msra.mxu0 %v3612_v15  ;;  %2642 = vmatpush1.bf16.msra.mxu1 %v3622_v19 }
 0x23f   :  { %2612 = vmatprep.subr.bf16.mxu0 %v3632_v24  ;;  %2644 = vmatprep.subr.bf16.mxu1 %v3642_v28 }
 0x242   :  { %2614 = vmatpush1.bf16.msra.mxu0 %v3655_v33  ;;  %2646 = vmatpush1.bf16.msra.mxu1 %v3665_v39 }
 0x243   :  { %2616 = vmatprep.subr.bf16.mxu0 %v3675_v43  ;;  %2648 = vmatprep.subr.bf16.mxu1 %v3685_v46 }
 0x246   :  { %2618 = vmatpush1.bf16.msra.mxu0 %v3698_v52  ;;  %2650 = vmatpush1.bf16.msra.mxu1 %v3708_v56 }
 0x247   :  { %2620 = vmatprep.subr.bf16.mxu0 %v3718_v60  ;;  %2652 = vmatprep.subr.bf16.mxu1 %v3728_v0 }
 0x24a   :  { %2622 = vmatpush1.bf16.msra.mxu0 %v3735_v4  ;;  %2654 = vmatpush1.bf16.msra.mxu1 %v3739_v6 }
 0x24b   :  { %2656 = vmatprep.subr.bf16.mxu0 %v3418_v17  ;;  %2688 = vmatprep.subr.bf16.mxu1 %v3429_v21 }
 0x300   :  { %v845_v27 = vpop.f32.mrb[4].mxu0  ;;  %v916_v53 = vpop.f32.mrb[4].mxu1 }
 0x301   :  { %v3107_v55 = vadd.f32 %v845_v27, %v3797_v14  ;;  %v847_v57 = vpop.f32.mrb[5].mxu0  ;;  %v918_v59 = vpop.f32.mrb[5].mxu1  ;;  %v3123_v12 = vadd.f32 %v916_v53, %v3808_v36 }
 0x302   :  { %v3108_v62 = vadd.f32 %v847_v57, %v3801_v16  ;;  %v3124_v23 = vadd.f32 %v918_v59, %v3814_v44 }
 0x303   :  { %v2356_v2 = vmul.f32 -1.442695, %v3107_v55  ;;  %v2358_v26 = vmul.f32 -1.442695, %v3123_v12 }
 0x304   :  { %v2357_v18 = vmul.f32 -1.442695, %v3108_v62 }
 0x305   :  { %3200 = vpow2.f32 %v2356_v2 }
 0x306   :  { %3202 = vpow2.f32 %v2357_v18 }
 0x307   :  { %3204 = vtanh.f32 %v3124_v23 }
 0x308   :  { %3206 = vpow2.f32 %v2358_v26 }
 0x30f   :  { %v3201_v30 = vpop.eup %3200 }
 0x310   :  { %v930_v31 = vadd.f32 1.0, %v3201_v30  ;;  %v3203_v32 = vpop.eup %3202 }
 0x311   :  { %v931_v7 = vadd.f32 1.0, %v3203_v32  ;;  %v3205_v41 = vpop.eup %3204 }
 0x312   :  { %3208 = vrcp.f32 %v930_v31  ;;  %v3207_v37 = vpop.eup %3206 }
 0x313   :  { %3210 = vrcp.f32 %v931_v7  ;;  %v932_v27 = vadd.f32 1.0, %v3207_v37 }
 0x315   :  { %3212 = vrcp.f32 %v932_v27 }
 0x31c   :  { %v3209_v48 = vpop.eup %3208 }
 0x31d   :  { %v941_v49 = vmul.f32 %v3209_v48, %v3205_v41  ;;  %v3211_v51 = vpop.eup %3210 }
 0x31e   :  { %v940_v55 = vmul.f32 %v3211_v51, %v3862_v45 }
 0x31f   :  { %v3213_v59 = vpop.eup %3212 }
 0x320   :  { %v942_v53 = vadd.f32 %v941_v49, %v940_v55 }
 0x322   :  { %3214 = vtanh.f32 %v942_v53  ;;  %v3904_v57 = vsel %vm945_vm3, %v942_v53, 0.0 }
 0x32c   :  { %v3215_v62 = vpop.eup %3214 }
 0x32d   :  { %v944_v2 = vmul.f32 %v3215_v62, %v3213_v59 }
 0x32f   :  { %2359 = vmatmul.mubr.msk.f32.vlgmr.msra.gmra.mrb[6].mxu0 %vm945_vm3, %v944_v2  ;;  %2360 = vmatmul.mubr.msk.f32.vlgmr.msra.gmra.mrb[6].mxu1 %vm945_vm3, %v944_v2 }
 0x330   :  { %2658 = vmatpush1.bf16.msra.mxu0 %v3431_v22  ;;  %2690 = vmatpush1.bf16.msra.mxu1 %v3440_v25 }
 0x331   :  { %2660 = vmatprep.subr.bf16.mxu0 %v3453_v29  ;;  %2692 = vmatprep.subr.bf16.mxu1 %v3469_v34 }
 0x332   :  { %1187 = vmatprep.mubr.f32.mxu0 %v3344_v3  ;;  %1258 = vmatprep.mubr.f32.mxu1 %v3344_v3 }
 0x334   :  { %2662 = vmatpush1.bf16.msra.mxu0 %v3471_v35  ;;  %2694 = vmatpush1.bf16.msra.mxu1 %v3481_v38 }
 0x335   :  { %2664 = vmatprep.subr.bf16.mxu0 %v3494_v42  ;;  %2696 = vmatprep.subr.bf16.mxu1 %v3510_v47 }
 0x338   :  { %2666 = vmatpush1.bf16.msra.mxu0 %v3520_v50  ;;  %2698 = vmatpush1.bf16.msra.mxu1 %v3533_v54 }
 0x339   :  { %2668 = vmatprep.subr.bf16.mxu0 %v3546_v58  ;;  %2700 = vmatprep.subr.bf16.mxu1 %v3556_v61 }
 0x33c   :  { %2670 = vmatpush1.bf16.msra.mxu0 %v3569_v1  ;;  %2702 = vmatpush1.bf16.msra.mxu1 %v3579_v5 }
 0x33d   :  { %2672 = vmatprep.subr.bf16.mxu0 %v3589_v8  ;;  %2704 = vmatprep.subr.bf16.mxu1 %v3599_v11 }
 0x340   :  { %2674 = vmatpush1.bf16.msra.mxu0 %v3612_v15  ;;  %2706 = vmatpush1.bf16.msra.mxu1 %v3622_v19 }
 0x341   :  { %2676 = vmatprep.subr.bf16.mxu0 %v3632_v24  ;;  %2708 = vmatprep.subr.bf16.mxu1 %v3642_v28 }
 0x344   :  { %2678 = vmatpush1.bf16.msra.mxu0 %v3655_v33  ;;  %2710 = vmatpush1.bf16.msra.mxu1 %v3665_v39 }
 0x345   :  { %2680 = vmatprep.subr.bf16.mxu0 %v3675_v43  ;;  %2712 = vmatprep.subr.bf16.mxu1 %v3685_v46 }
 0x348   :  { %2682 = vmatpush1.bf16.msra.mxu0 %v3698_v52  ;;  %2714 = vmatpush1.bf16.msra.mxu1 %v3708_v56 }
 0x349   :  { %2684 = vmatprep.subr.bf16.mxu0 %v3718_v60  ;;  %2716 = vmatprep.subr.bf16.mxu1 %v3728_v0 }
 0x34c   :  { %2686 = vmatpush1.bf16.msra.mxu0 %v3735_v4  ;;  %2718 = vmatpush1.bf16.msra.mxu1 %v3739_v6 }
 0x34d   :  { %2720 = vmatprep.subr.bf16.mxu0 %v3418_v17  ;;  %2752 = vmatprep.subr.bf16.mxu1 %v3429_v21 }
 0x402   :  { %v1018_v63 = vpop.f32.mrb[6].mxu0  ;;  %v1089_v45 = vpop.f32.mrb[6].mxu1 }
 0x403   :  { %v3109_v18 = vadd.f32 %v1018_v63, %v3797_v14  ;;  %v1020_v12 = vpop.f32.mrb[7].mxu0  ;;  %v1091_v23 = vpop.f32.mrb[7].mxu1  ;;  %v3125_v32 = vadd.f32 %v1089_v45, %v3808_v36 }
 0x404   :  { %v3110_v26 = vadd.f32 %v1020_v12, %v3801_v16  ;;  %v3126_v7 = vadd.f32 %v1091_v23, %v3814_v44 }
 0x405   :  { %v2361_v30 = vmul.f32 -1.442695, %v3109_v18  ;;  %v2363_v41 = vmul.f32 -1.442695, %v3125_v32 }
 0x406   :  { %v2362_v31 = vmul.f32 -1.442695, %v3110_v26 }
 0x407   :  { %3216 = vpow2.f32 %v2361_v30 }
 0x408   :  { %3218 = vpow2.f32 %v2362_v31 }
 0x409   :  { %3220 = vtanh.f32 %v3126_v7 }
 0x40a   :  { %3222 = vpow2.f32 %v2363_v41 }
 0x411   :  { %v3217_v37 = vpop.eup %3216 }
 0x412   :  { %v1103_v48 = vadd.f32 1.0, %v3217_v37  ;;  %v3219_v49 = vpop.eup %3218 }
 0x413   :  { %v1104_v51 = vadd.f32 1.0, %v3219_v49  ;;  %v3221_v27 = vpop.eup %3220 }
 0x414   :  { %3224 = vrcp.f32 %v1103_v48  ;;  %v3223_v55 = vpop.eup %3222 }
 0x415   :  { %3226 = vrcp.f32 %v1104_v51  ;;  %v1105_v2 = vadd.f32 1.0, %v3223_v55 }
 0x417   :  { %3228 = vrcp.f32 %v1105_v2 }
 0x41e   :  { %v3225_v53 = vpop.eup %3224 }
 0x41f   :  { %v1114_v59 = vmul.f32 %v3225_v53, %v3221_v27  ;;  %v3227_v62 = vpop.eup %3226 }
 0x420   :  { %v1113_v63 = vmul.f32 %v3227_v62, %v3904_v57 }
 0x421   :  { %v3229_v18 = vpop.eup %3228 }
 0x422   :  { %v3945_v45 = vadd.f32 %v1114_v59, %v1113_v63 }
 0x424   :  { %3230 = vtanh.f32 %v3945_v45 }
 0x42e   :  { %v3231_v12 = vpop.eup %3230 }
 0x42f   :  { %v1117_v23 = vmul.f32 %v3231_v12, %v3229_v18 }
 0x431   :  { %1118 = vst [vmem:[%s4272_s4] sm:$0xff] %v1117_v23  ;;  %1188 = vmatmul.mubr.f32.vlgmr.msra.gmra.mrb[8].mxu0 %v1117_v23  ;;  %1259 = vmatmul.mubr.f32.vlgmr.msra.gmra.mrb[8].mxu1 %v1117_v23 }
 0x432   :  { %2722 = vmatpush1.bf16.msra.mxu0 %v3431_v22  ;;  %2754 = vmatpush1.bf16.msra.mxu1 %v3440_v25 }
 0x433   :  { %2724 = vmatprep.subr.bf16.mxu0 %v3453_v29  ;;  %2756 = vmatprep.subr.bf16.mxu1 %v3469_v34 }
 0x434   :  { %1358 = vmatprep.mubr.f32.mxu0 %v3344_v3  ;;  %1429 = vmatprep.mubr.f32.mxu1 %v3344_v3 }
 0x436   :  { %2726 = vmatpush1.bf16.msra.mxu0 %v3471_v35  ;;  %2758 = vmatpush1.bf16.msra.mxu1 %v3481_v38 }
 0x437   :  { %2728 = vmatprep.subr.bf16.mxu0 %v3494_v42  ;;  %2760 = vmatprep.subr.bf16.mxu1 %v3510_v47 }
 0x43a   :  { %2730 = vmatpush1.bf16.msra.mxu0 %v3520_v50  ;;  %2762 = vmatpush1.bf16.msra.mxu1 %v3533_v54 }
 0x43b   :  { %2732 = vmatprep.subr.bf16.mxu0 %v3546_v58  ;;  %2764 = vmatprep.subr.bf16.mxu1 %v3556_v61 }
 0x43e   :  { %2734 = vmatpush1.bf16.msra.mxu0 %v3569_v1  ;;  %2766 = vmatpush1.bf16.msra.mxu1 %v3579_v5 }
 0x43f   :  { %2736 = vmatprep.subr.bf16.mxu0 %v3589_v8  ;;  %2768 = vmatprep.subr.bf16.mxu1 %v3599_v11 }
 0x442   :  { %2738 = vmatpush1.bf16.msra.mxu0 %v3612_v15  ;;  %2770 = vmatpush1.bf16.msra.mxu1 %v3622_v19 }
 0x443   :  { %2740 = vmatprep.subr.bf16.mxu0 %v3632_v24  ;;  %2772 = vmatprep.subr.bf16.mxu1 %v3642_v28 }
 0x446   :  { %2742 = vmatpush1.bf16.msra.mxu0 %v3655_v33  ;;  %2774 = vmatpush1.bf16.msra.mxu1 %v3665_v39 }
 0x447   :  { %2744 = vmatprep.subr.bf16.mxu0 %v3675_v43  ;;  %2776 = vmatprep.subr.bf16.mxu1 %v3685_v46 }
 0x44a   :  { %2746 = vmatpush1.bf16.msra.mxu0 %v3698_v52  ;;  %2778 = vmatpush1.bf16.msra.mxu1 %v3708_v56 }
 0x44b   :  { %2748 = vmatprep.subr.bf16.mxu0 %v3718_v60  ;;  %2780 = vmatprep.subr.bf16.mxu1 %v3728_v0 }
 0x44e   :  { %2750 = vmatpush1.bf16.msra.mxu0 %v3735_v4  ;;  %2782 = vmatpush1.bf16.msra.mxu1 %v3739_v6 }
 0x44f   :  { %2784 = vmatprep.subr.bf16.mxu0 %v3418_v17  ;;  %2816 = vmatprep.subr.bf16.mxu1 %v3429_v21 }
 0x504   :  { %v1189_v57 = vpop.f32.mrb[8].mxu0  ;;  %v1260_v26 = vpop.f32.mrb[8].mxu1 }
 0x505   :  { %v3111_v30 = vadd.f32 %v1189_v57, %v3797_v14  ;;  %v1191_v31 = vpop.f32.mrb[9].mxu0  ;;  %v1262_v32 = vpop.f32.mrb[9].mxu1  ;;  %v3127_v48 = vadd.f32 %v1260_v26, %v3808_v36 }
 0x506   :  { %v3112_v7 = vadd.f32 %v1191_v31, %v3801_v16  ;;  %v3128_v49 = vadd.f32 %v1262_v32, %v3814_v44 }
 0x507   :  { %v2364_v41 = vmul.f32 -1.442695, %v3111_v30  ;;  %v2366_v51 = vmul.f32 -1.442695, %v3127_v48 }
 0x508   :  { %v2365_v37 = vmul.f32 -1.442695, %v3112_v7 }
 0x509   :  { %3232 = vpow2.f32 %v2364_v41 }
 0x50a   :  { %3234 = vpow2.f32 %v2365_v37 }
 0x50b   :  { %3236 = vtanh.f32 %v3128_v49 }
 0x50c   :  { %3238 = vpow2.f32 %v2366_v51 }
 0x513   :  { %v3233_v27 = vpop.eup %3232 }
 0x514   :  { %v1274_v55 = vadd.f32 1.0, %v3233_v27  ;;  %v3235_v53 = vpop.eup %3234 }
 0x515   :  { %v1275_v59 = vadd.f32 1.0, %v3235_v53  ;;  %v3237_v62 = vpop.eup %3236 }
 0x516   :  { %3240 = vrcp.f32 %v1274_v55  ;;  %v3239_v2 = vpop.eup %3238 }
 0x517   :  { %3242 = vrcp.f32 %v1275_v59  ;;  %v1276_v23 = vadd.f32 1.0, %v3239_v2 }
 0x519   :  { %3244 = vrcp.f32 %v1276_v23 }
 0x520   :  { %v3241_v63 = vpop.eup %3240 }
 0x521   :  { %v1285_v18 = vmul.f32 %v3241_v63, %v3237_v62  ;;  %v3243_v12 = vpop.eup %3242 }
 0x522   :  { %v1284_v57 = vmul.f32 %v3243_v12, %v3945_v45 }
 0x523   :  { %v3245_v30 = vpop.eup %3244 }
 0x524   :  { %v3990_v26 = vadd.f32 %v1285_v18, %v1284_v57 }
 0x526   :  { %3246 = vtanh.f32 %v3990_v26 }
 0x530   :  { %v3247_v31 = vpop.eup %3246 }
 0x531   :  { %v1288_v32 = vmul.f32 %v3247_v31, %v3245_v30 }
 0x533   :  { %1289 = vst [vmem:[%s4272_s4 + $0x8] sm:$0xff] %v1288_v32  ;;  %1359 = vmatmul.mubr.f32.vlgmr.msra.gmra.mrb[10].mxu0 %v1288_v32  ;;  %1430 = vmatmul.mubr.f32.vlgmr.msra.gmra.mrb[10].mxu1 %v1288_v32 }
 0x534   :  { %2786 = vmatpush1.bf16.msra.mxu0 %v3431_v22  ;;  %2818 = vmatpush1.bf16.msra.mxu1 %v3440_v25 }
 0x535   :  { %2788 = vmatprep.subr.bf16.mxu0 %v3453_v29  ;;  %2820 = vmatprep.subr.bf16.mxu1 %v3469_v34 }
 0x536   :  { %1529 = vmatprep.mubr.f32.mxu0 %v3344_v3  ;;  %1600 = vmatprep.mubr.f32.mxu1 %v3344_v3 }
 0x538   :  { %2790 = vmatpush1.bf16.msra.mxu0 %v3471_v35  ;;  %2822 = vmatpush1.bf16.msra.mxu1 %v3481_v38 }
 0x539   :  { %2792 = vmatprep.subr.bf16.mxu0 %v3494_v42  ;;  %2824 = vmatprep.subr.bf16.mxu1 %v3510_v47 }
 0x53c   :  { %2794 = vmatpush1.bf16.msra.mxu0 %v3520_v50  ;;  %2826 = vmatpush1.bf16.msra.mxu1 %v3533_v54 }
 0x53d   :  { %2796 = vmatprep.subr.bf16.mxu0 %v3546_v58  ;;  %2828 = vmatprep.subr.bf16.mxu1 %v3556_v61 }
 0x540   :  { %2798 = vmatpush1.bf16.msra.mxu0 %v3569_v1  ;;  %2830 = vmatpush1.bf16.msra.mxu1 %v3579_v5 }
 0x541   :  { %2800 = vmatprep.subr.bf16.mxu0 %v3589_v8  ;;  %2832 = vmatprep.subr.bf16.mxu1 %v3599_v11 }
 0x544   :  { %2802 = vmatpush1.bf16.msra.mxu0 %v3612_v15  ;;  %2834 = vmatpush1.bf16.msra.mxu1 %v3622_v19 }
 0x545   :  { %2804 = vmatprep.subr.bf16.mxu0 %v3632_v24  ;;  %2836 = vmatprep.subr.bf16.mxu1 %v3642_v28 }
 0x548   :  { %2806 = vmatpush1.bf16.msra.mxu0 %v3655_v33  ;;  %2838 = vmatpush1.bf16.msra.mxu1 %v3665_v39 }
 0x549   :  { %2808 = vmatprep.subr.bf16.mxu0 %v3675_v43  ;;  %2840 = vmatprep.subr.bf16.mxu1 %v3685_v46 }
 0x54c   :  { %2810 = vmatpush1.bf16.msra.mxu0 %v3698_v52  ;;  %2842 = vmatpush1.bf16.msra.mxu1 %v3708_v56 }
 0x54d   :  { %2812 = vmatprep.subr.bf16.mxu0 %v3718_v60  ;;  %2844 = vmatprep.subr.bf16.mxu1 %v3728_v0 }
 0x550   :  { %2814 = vmatpush1.bf16.msra.mxu0 %v3735_v4  ;;  %2846 = vmatpush1.bf16.msra.mxu1 %v3739_v6 }
 0x551   :  { %2848 = vmatprep.subr.bf16.mxu0 %v3418_v17  ;;  %2880 = vmatprep.subr.bf16.mxu1 %v3429_v21 }
 0x606   :  { %v1360_v45 = vpop.f32.mrb[10].mxu0  ;;  %v1431_v7 = vpop.f32.mrb[10].mxu1 }
 0x607   :  { %v3113_v41 = vadd.f32 %v1360_v45, %v3797_v14  ;;  %v1362_v37 = vpop.f32.mrb[11].mxu0  ;;  %v1433_v48 = vpop.f32.mrb[11].mxu1  ;;  %v3129_v55 = vadd.f32 %v1431_v7, %v3808_v36 }
 0x608   :  { %v3114_v49 = vadd.f32 %v1362_v37, %v3801_v16  ;;  %v3130_v53 = vadd.f32 %v1433_v48, %v3814_v44 }
 0x609   :  { %v2367_v51 = vmul.f32 -1.442695, %v3113_v41  ;;  %v2369_v59 = vmul.f32 -1.442695, %v3129_v55 }
 0x60a   :  { %v2368_v27 = vmul.f32 -1.442695, %v3114_v49 }
 0x60b   :  { %3248 = vpow2.f32 %v2367_v51 }
 0x60c   :  { %3250 = vpow2.f32 %v2368_v27 }
 0x60d   :  { %3252 = vtanh.f32 %v3130_v53 }
 0x60e   :  { %3254 = vpow2.f32 %v2369_v59 }
 0x615   :  { %v3249_v62 = vpop.eup %3248 }
 0x616   :  { %v1445_v2 = vadd.f32 1.0, %v3249_v62  ;;  %v3251_v63 = vpop.eup %3250 }
 0x617   :  { %v1446_v18 = vadd.f32 1.0, %v3251_v63  ;;  %v3253_v12 = vpop.eup %3252 }
 0x618   :  { %3256 = vrcp.f32 %v1445_v2  ;;  %v3255_v23 = vpop.eup %3254 }
 0x619   :  { %3258 = vrcp.f32 %v1446_v18  ;;  %v1447_v32 = vadd.f32 1.0, %v3255_v23 }
 0x61b   :  { %3260 = vrcp.f32 %v1447_v32 }
 0x622   :  { %v3257_v57 = vpop.eup %3256 }
 0x623   :  { %v1456_v30 = vmul.f32 %v3257_v57, %v3253_v12  ;;  %v3259_v31 = vpop.eup %3258 }
 0x624   :  { %v1455_v45 = vmul.f32 %v3259_v31, %v3990_v26 }
 0x625   :  { %v3261_v41 = vpop.eup %3260 }
 0x626   :  { %v4035_v7 = vadd.f32 %v1456_v30, %v1455_v45 }
 0x628   :  { %3262 = vtanh.f32 %v4035_v7 }
 0x632   :  { %v3263_v37 = vpop.eup %3262 }
 0x633   :  { %v1459_v48 = vmul.f32 %v3263_v37, %v3261_v41 }
 0x635   :  { %1460 = vst [vmem:[%s4272_s4 + $0x10] sm:$0xff] %v1459_v48  ;;  %1530 = vmatmul.mubr.f32.vlgmr.msra.gmra.mrb[12].mxu0 %v1459_v48  ;;  %1601 = vmatmul.mubr.f32.vlgmr.msra.gmra.mrb[12].mxu1 %v1459_v48 }
 0x636   :  { %2850 = vmatpush1.bf16.msra.mxu0 %v3431_v22  ;;  %2882 = vmatpush1.bf16.msra.mxu1 %v3440_v25 }
 0x637   :  { %2852 = vmatprep.subr.bf16.mxu0 %v3453_v29  ;;  %2884 = vmatprep.subr.bf16.mxu1 %v3469_v34 }
 0x638   :  { %1700 = vmatprep.mubr.f32.mxu0 %v3344_v3  ;;  %1771 = vmatprep.mubr.f32.mxu1 %v3344_v3 }
 0x63a   :  { %2854 = vmatpush1.bf16.msra.mxu0 %v3471_v35  ;;  %2886 = vmatpush1.bf16.msra.mxu1 %v3481_v38 }
 0x63b   :  { %2856 = vmatprep.subr.bf16.mxu0 %v3494_v42  ;;  %2888 = vmatprep.subr.bf16.mxu1 %v3510_v47 }
 0x63e   :  { %2858 = vmatpush1.bf16.msra.mxu0 %v3520_v50  ;;  %2890 = vmatpush1.bf16.msra.mxu1 %v3533_v54 }
 0x63f   :  { %2860 = vmatprep.subr.bf16.mxu0 %v3546_v58  ;;  %2892 = vmatprep.subr.bf16.mxu1 %v3556_v61 }
 0x642   :  { %2862 = vmatpush1.bf16.msra.mxu0 %v3569_v1  ;;  %2894 = vmatpush1.bf16.msra.mxu1 %v3579_v5 }
 0x643   :  { %2864 = vmatprep.subr.bf16.mxu0 %v3589_v8  ;;  %2896 = vmatprep.subr.bf16.mxu1 %v3599_v11 }
 0x646   :  { %2866 = vmatpush1.bf16.msra.mxu0 %v3612_v15  ;;  %2898 = vmatpush1.bf16.msra.mxu1 %v3622_v19 }
 0x647   :  { %2868 = vmatprep.subr.bf16.mxu0 %v3632_v24  ;;  %2900 = vmatprep.subr.bf16.mxu1 %v3642_v28 }
 0x64a   :  { %2870 = vmatpush1.bf16.msra.mxu0 %v3655_v33  ;;  %2902 = vmatpush1.bf16.msra.mxu1 %v3665_v39 }
 0x64b   :  { %2872 = vmatprep.subr.bf16.mxu0 %v3675_v43  ;;  %2904 = vmatprep.subr.bf16.mxu1 %v3685_v46 }
 0x64e   :  { %2874 = vmatpush1.bf16.msra.mxu0 %v3698_v52  ;;  %2906 = vmatpush1.bf16.msra.mxu1 %v3708_v56 }
 0x64f   :  { %2876 = vmatprep.subr.bf16.mxu0 %v3718_v60  ;;  %2908 = vmatprep.subr.bf16.mxu1 %v3728_v0 }
 0x652   :  { %2878 = vmatpush1.bf16.msra.mxu0 %v3735_v4  ;;  %2910 = vmatpush1.bf16.msra.mxu1 %v3739_v6 }
 0x653   :  { %2912 = vmatprep.subr.bf16.mxu0 %v3418_v17  ;;  %2944 = vmatprep.subr.bf16.mxu1 %v3429_v21 }
 0x708   :  { %v1531_v26 = vpop.f32.mrb[12].mxu0  ;;  %v1602_v49 = vpop.f32.mrb[12].mxu1 }
 0x709   :  { %v3115_v51 = vadd.f32 %v1531_v26, %v3797_v14  ;;  %v1533_v27 = vpop.f32.mrb[13].mxu0  ;;  %v1604_v55 = vpop.f32.mrb[13].mxu1  ;;  %v3131_v2 = vadd.f32 %v1602_v49, %v3808_v36 }
 0x70a   :  { %v3116_v53 = vadd.f32 %v1533_v27, %v3801_v16  ;;  %v3132_v63 = vadd.f32 %v1604_v55, %v3814_v44 }
 0x70b   :  { %v2370_v59 = vmul.f32 -1.442695, %v3115_v51  ;;  %v2372_v18 = vmul.f32 -1.442695, %v3131_v2 }
 0x70c   :  { %v2371_v62 = vmul.f32 -1.442695, %v3116_v53 }
 0x70d   :  { %3264 = vpow2.f32 %v2370_v59 }
 0x70e   :  { %3266 = vpow2.f32 %v2371_v62 }
 0x70f   :  { %3268 = vtanh.f32 %v3132_v63 }
 0x710   :  { %3270 = vpow2.f32 %v2372_v18 }
 0x717   :  { %v3265_v12 = vpop.eup %3264 }
 0x718   :  { %v1616_v23 = vadd.f32 1.0, %v3265_v12  ;;  %v3267_v57 = vpop.eup %3266 }
 0x719   :  { %v1617_v30 = vadd.f32 1.0, %v3267_v57  ;;  %v3269_v31 = vpop.eup %3268 }
 0x71a   :  { %3272 = vrcp.f32 %v1616_v23  ;;  %v3271_v32 = vpop.eup %3270 }
 0x71b   :  { %3274 = vrcp.f32 %v1617_v30  ;;  %v1618_v48 = vadd.f32 1.0, %v3271_v32 }
 0x71d   :  { %3276 = vrcp.f32 %v1618_v48 }
 0x724   :  { %v3273_v45 = vpop.eup %3272 }
 0x725   :  { %v1627_v41 = vmul.f32 %v3273_v45, %v3269_v31  ;;  %v3275_v37 = vpop.eup %3274 }
 0x726   :  { %v1626_v26 = vmul.f32 %v3275_v37, %v4035_v7 }
 0x727   :  { %v3277_v51 = vpop.eup %3276 }
 0x728   :  { %v4080_v49 = vadd.f32 %v1627_v41, %v1626_v26 }
 0x72a   :  { %3278 = vtanh.f32 %v4080_v49 }
 0x734   :  { %v3279_v27 = vpop.eup %3278 }
 0x735   :  { %v1630_v55 = vmul.f32 %v3279_v27, %v3277_v51 }
 0x737   :  { %1631 = vst [vmem:[%s4272_s4 + $0x18] sm:$0xff] %v1630_v55  ;;  %1701 = vmatmul.mubr.f32.vlgmr.msra.gmra.mrb[14].mxu0 %v1630_v55  ;;  %1772 = vmatmul.mubr.f32.vlgmr.msra.gmra.mrb[14].mxu1 %v1630_v55 }
 0x738   :  { %2914 = vmatpush1.bf16.msra.mxu0 %v3431_v22  ;;  %2946 = vmatpush1.bf16.msra.mxu1 %v3440_v25 }
 0x739   :  { %2916 = vmatprep.subr.bf16.mxu0 %v3453_v29  ;;  %2948 = vmatprep.subr.bf16.mxu1 %v3469_v34 }
 0x73a   :  { %1869 = vmatprep.mubr.f32.mxu0 %v3344_v3  ;;  %1940 = vmatprep.mubr.f32.mxu1 %v3344_v3 }
 0x73c   :  { %2918 = vmatpush1.bf16.msra.mxu0 %v3471_v35  ;;  %2950 = vmatpush1.bf16.msra.mxu1 %v3481_v38 }
 0x73d   :  { %2920 = vmatprep.subr.bf16.mxu0 %v3494_v42  ;;  %2952 = vmatprep.subr.bf16.mxu1 %v3510_v47 }
 0x740   :  { %2922 = vmatpush1.bf16.msra.mxu0 %v3520_v50  ;;  %2954 = vmatpush1.bf16.msra.mxu1 %v3533_v54 }
 0x741   :  { %2924 = vmatprep.subr.bf16.mxu0 %v3546_v58  ;;  %2956 = vmatprep.subr.bf16.mxu1 %v3556_v61 }
 0x744   :  { %2926 = vmatpush1.bf16.msra.mxu0 %v3569_v1  ;;  %2958 = vmatpush1.bf16.msra.mxu1 %v3579_v5 }
 0x745   :  { %2928 = vmatprep.subr.bf16.mxu0 %v3589_v8  ;;  %2960 = vmatprep.subr.bf16.mxu1 %v3599_v11 }
 0x748   :  { %2930 = vmatpush1.bf16.msra.mxu0 %v3612_v15  ;;  %2962 = vmatpush1.bf16.msra.mxu1 %v3622_v19 }
 0x749   :  { %2932 = vmatprep.subr.bf16.mxu0 %v3632_v24  ;;  %2964 = vmatprep.subr.bf16.mxu1 %v3642_v28 }
 0x74c   :  { %2934 = vmatpush1.bf16.msra.mxu0 %v3655_v33  ;;  %2966 = vmatpush1.bf16.msra.mxu1 %v3665_v39 }
 0x74d   :  { %2936 = vmatprep.subr.bf16.mxu0 %v3675_v43  ;;  %2968 = vmatprep.subr.bf16.mxu1 %v3685_v46 }
 0x750   :  { %2938 = vmatpush1.bf16.msra.mxu0 %v3698_v52  ;;  %2970 = vmatpush1.bf16.msra.mxu1 %v3708_v56 }
 0x751   :  { %2940 = vmatprep.subr.bf16.mxu0 %v3718_v60  ;;  %2972 = vmatprep.subr.bf16.mxu1 %v3728_v0 }
 0x754   :  { %2942 = vmatpush1.bf16.msra.mxu0 %v3735_v4  ;;  %2974 = vmatpush1.bf16.msra.mxu1 %v3739_v6 }
 0x755   :  { %2976 = vmatprep.subr.bf16.mxu0 %v3418_v17  ;;  %3008 = vmatprep.subr.bf16.mxu1 %v3429_v21 }
 0x80a   :  { %v1702_v7 = vpop.f32.mrb[14].mxu0  ;;  %v1773_v53 = vpop.f32.mrb[14].mxu1 }
 0x80b   :  { %v3117_v59 = vadd.f32 %v1702_v7, %v3797_v14  ;;  %v1704_v62 = vpop.f32.mrb[15].mxu0  ;;  %v1775_v2 = vpop.f32.mrb[15].mxu1  ;;  %v3133_v23 = vadd.f32 %v1773_v53, %v3808_v36 }
 0x80c   :  { %v3118_v63 = vadd.f32 %v1704_v62, %v3801_v16  ;;  %v3134_v57 = vadd.f32 %v1775_v2, %v3814_v44 }
 0x80d   :  { %v2373_v18 = vmul.f32 -1.442695, %v3117_v59  ;;  %v2375_v30 = vmul.f32 -1.442695, %v3133_v23 }
 0x80e   :  { %v2374_v12 = vmul.f32 -1.442695, %v3118_v63 }
 0x80f   :  { %3280 = vpow2.f32 %v2373_v18 }
 0x810   :  { %3282 = vpow2.f32 %v2374_v12 }
 0x811   :  { %3284 = vtanh.f32 %v3134_v57 }
 0x812   :  { %3286 = vpow2.f32 %v2375_v30 }
 0x819   :  { %v3281_v31 = vpop.eup %3280 }
 0x81a   :  { %v1787_v32 = vadd.f32 1.0, %v3281_v31  ;;  %v3283_v45 = vpop.eup %3282 }
 0x81b   :  { %v1788_v14 = vadd.f32 1.0, %v3283_v45  ;;  %v3285_v41 = vpop.eup %3284 }
 0x81c   :  { %3288 = vrcp.f32 %v1787_v32  ;;  %v3287_v37 = vpop.eup %3286 }
 0x81d   :  { %3290 = vrcp.f32 %v1788_v14  ;;  %v1789_v51 = vadd.f32 1.0, %v3287_v37 }
 0x81f   :  { %3292 = vrcp.f32 %v1789_v51 }
 0x826   :  { %v3289_v16 = vpop.eup %3288 }
 0x827   :  { %v1798_v48 = vmul.f32 %v3289_v16, %v3285_v41  ;;  %v3291_v26 = vpop.eup %3290 }
 0x828   :  { %v1797_v27 = vmul.f32 %v3291_v26, %v4080_v49  ;;  %v405_v49 = vld [vmem:[%s4271_s3] sm:$0xf] }
 0x829   :  { %v3293_v44 = vpop.eup %3292  ;;  %v4177_v53 = vrot.slane %v405_v49, %v40_v10  ;;  %v4181_v59 = vrot.slane %v405_v49, %v44_v13  ;;  %v4187_v57 = vrot.slane %v405_v49, %v48_v20  ;;  %v4191_v10 = vrot.slane %v405_v49, %v52_v40 }
 0x82a   :  { %v4125_v36 = vadd.f32 %v1798_v48, %v1797_v27 }
 0x82c   :  { %1804 = vst [vmem:[%s4273_s6] sm:$0xff] %v4125_v36  ;;  %3294 = vtanh.f32 %v4125_v36 }
 0x836   :  { %v3295_v55 = vpop.eup %3294 }
 0x837   :  { %v1801_v7 = vmul.f32 %v3295_v55, %v3293_v44 }
 0x839   :  { %1802 = vst [vmem:[%s4272_s4 + $0x20] sm:$0xff] %v1801_v7  ;;  %1803 = vst [vmem:[%s4274_s5] sm:$0xff] %v1801_v7  ;;  %1870 = vmatmul.mubr.f32.vlgmr.msra.gmra.mrb[16].mxu0 %v1801_v7  ;;  %1941 = vmatmul.mubr.f32.vlgmr.msra.gmra.mrb[16].mxu1 %v1801_v7 }
 0x83a   :  { %2978 = vmatpush1.bf16.msra.mxu0 %v3431_v22  ;;  %3010 = vmatpush1.bf16.msra.mxu1 %v3440_v25 }
 0x83b   :  { %2980 = vmatprep.subr.bf16.mxu0 %v3453_v29  ;;  %3012 = vmatprep.subr.bf16.mxu1 %v3469_v34 }
 0x83c   :  { %2040 = vmatprep.mubr.f32.mxu0 %v3344_v3  ;;  %2111 = vmatprep.mubr.f32.mxu1 %v3344_v3 }
 0x83e   :  { %2982 = vmatpush1.bf16.msra.mxu0 %v3471_v35  ;;  %3014 = vmatpush1.bf16.msra.mxu1 %v3481_v38 }
 0x83f   :  { %2984 = vmatprep.subr.bf16.mxu0 %v3494_v42  ;;  %3016 = vmatprep.subr.bf16.mxu1 %v3510_v47 }
 0x842   :  { %2986 = vmatpush1.bf16.msra.mxu0 %v3520_v50  ;;  %3018 = vmatpush1.bf16.msra.mxu1 %v3533_v54 }
 0x843   :  { %2988 = vmatprep.subr.bf16.mxu0 %v3546_v58  ;;  %3020 = vmatprep.subr.bf16.mxu1 %v3556_v61 }
 0x846   :  { %2990 = vmatpush1.bf16.msra.mxu0 %v3569_v1  ;;  %3022 = vmatpush1.bf16.msra.mxu1 %v3579_v5 }
 0x847   :  { %2992 = vmatprep.subr.bf16.mxu0 %v3589_v8  ;;  %3024 = vmatprep.subr.bf16.mxu1 %v3599_v11 }
 0x84a   :  { %2994 = vmatpush1.bf16.msra.mxu0 %v3612_v15  ;;  %3026 = vmatpush1.bf16.msra.mxu1 %v3622_v19 }
 0x84b   :  { %2996 = vmatprep.subr.bf16.mxu0 %v3632_v24  ;;  %3028 = vmatprep.subr.bf16.mxu1 %v3642_v28 }
 0x84e   :  { %2998 = vmatpush1.bf16.msra.mxu0 %v3655_v33  ;;  %3030 = vmatpush1.bf16.msra.mxu1 %v3665_v39 }
 0x84f   :  { %3000 = vmatprep.subr.bf16.mxu0 %v3675_v43  ;;  %3032 = vmatprep.subr.bf16.mxu1 %v3685_v46 }
 0x852   :  { %3002 = vmatpush1.bf16.msra.mxu0 %v3698_v52  ;;  %3034 = vmatpush1.bf16.msra.mxu1 %v3708_v56 }
 0x853   :  { %3004 = vmatprep.subr.bf16.mxu0 %v3718_v60  ;;  %3036 = vmatprep.subr.bf16.mxu1 %v3728_v0 }
 0x856   :  { %3006 = vmatpush1.bf16.msra.mxu0 %v3735_v4  ;;  %3038 = vmatpush1.bf16.msra.mxu1 %v3739_v6 }
 0x857   :  { %3040 = vmatprep.subr.bf16.mxu0 %v3418_v17  ;;  %3072 = vmatprep.subr.bf16.mxu1 %v3429_v21 }
 0x90c   :  { %v1871_v62 = vpop.f32.mrb[16].mxu0  ;;  %v1942_v2 = vpop.f32.mrb[16].mxu1 }
 0x90d   :  { %v1872_v63 = vadd.f32 %v1871_v62, %v4177_v53  ;;  %v1873_v18 = vpop.f32.mrb[17].mxu0  ;;  %v1944_v17 = vpop.f32.mrb[17].mxu1  ;;  %v1943_v13 = vadd.f32 %v1942_v2, %v4187_v57 }
 0x90e   :  { %v1874_v21 = vadd.f32 %v1873_v18, %v4181_v59  ;;  %v1945_v30 = vadd.f32 %v1944_v17, %v4191_v10 }
 0x90f   :  { %v2376_v12 = vmul.f32 -1.442695, %v1872_v63  ;;  %v2378_v31 = vmul.f32 -1.442695, %v1943_v13 }
 0x910   :  { %v2377_v23 = vmul.f32 -1.442695, %v1874_v21 }
 0x911   :  { %3296 = vpow2.f32 %v2376_v12 }
 0x912   :  { %3298 = vpow2.f32 %v2377_v23 }
 0x913   :  { %3300 = vtanh.f32 %v1945_v30 }
 0x914   :  { %3302 = vpow2.f32 %v2378_v31 }
 0x91b   :  { %v3297_v32 = vpop.eup %3296 }
 0x91c   :  { %v1956_v45 = vadd.f32 1.0, %v3297_v32  ;;  %v3299_v14 = vpop.eup %3298 }
 0x91d   :  { %v1957_v41 = vadd.f32 1.0, %v3299_v14  ;;  %v3301_v20 = vpop.eup %3300 }
 0x91e   :  { %3304 = vrcp.f32 %v1956_v45  ;;  %v3303_v37 = vpop.eup %3302 }
 0x91f   :  { %3306 = vrcp.f32 %v1957_v41  ;;  %v1958_v40 = vadd.f32 1.0, %v3303_v37 }
 0x921   :  { %3308 = vrcp.f32 %v1958_v40 }
 0x928   :  { %v3305_v16 = vpop.eup %3304 }
 0x929   :  { %v1967_v48 = vmul.f32 %v3305_v16, %v3301_v20  ;;  %v3307_v9 = vpop.eup %3306 }
 0x92a   :  { %v1966_v26 = vmul.f32 %v3307_v9, %v4125_v36 }
 0x92b   :  { %v3309_v27 = vpop.eup %3308 }
 0x92c   :  { %v4196_v51 = vadd.f32 %v1967_v48, %v1966_v26 }
 0x92e   :  { %2380 = vst [vmem:[%s4273_s6 + $0x8] sm:$0xff] %v4196_v51  ;;  %3310 = vtanh.f32 %v4196_v51 }
 0x938   :  { %v3311_v44 = vpop.eup %3310 }
 0x939   :  { %v1970_v55 = vmul.f32 %v3311_v44, %v3309_v27 }
 0x93b   :  { %1971 = vst [vmem:[%s4272_s4 + $0x28] sm:$0xff] %v1970_v55  ;;  %2379 = vst [vmem:[%s4274_s5 + $0x8] sm:$0xff] %v1970_v55  ;;  %2041 = vmatmul.mubr.f32.vlgmr.msra.gmra.mrb[18].mxu0 %v1970_v55  ;;  %2112 = vmatmul.mubr.f32.vlgmr.msra.gmra.mrb[18].mxu1 %v1970_v55 }
 0x93c   :  { %3042 = vmatpush1.bf16.msra.mxu0 %v3431_v22  ;;  %3074 = vmatpush1.bf16.msra.mxu1 %v3440_v25 }
 0x93d   :  { %3044 = vmatprep.subr.bf16.mxu0 %v3453_v29  ;;  %3076 = vmatprep.subr.bf16.mxu1 %v3469_v34 }
 0x93e   :  { %2211 = vmatprep.mubr.f32.mxu0 %v3344_v3  ;;  %2282 = vmatprep.mubr.f32.mxu1 %v3344_v3 }
 0x940   :  { %3046 = vmatpush1.bf16.msra.mxu0 %v3471_v35  ;;  %3078 = vmatpush1.bf16.msra.mxu1 %v3481_v38 }
 0x941   :  { %3048 = vmatprep.subr.bf16.mxu0 %v3494_v42  ;;  %3080 = vmatprep.subr.bf16.mxu1 %v3510_v47 }
 0x944   :  { %3050 = vmatpush1.bf16.msra.mxu0 %v3520_v50  ;;  %3082 = vmatpush1.bf16.msra.mxu1 %v3533_v54 }
 0x945   :  { %3052 = vmatprep.subr.bf16.mxu0 %v3546_v58  ;;  %3084 = vmatprep.subr.bf16.mxu1 %v3556_v61 }
 0x948   :  { %3054 = vmatpush1.bf16.msra.mxu0 %v3569_v1  ;;  %3086 = vmatpush1.bf16.msra.mxu1 %v3579_v5 }
 0x949   :  { %3056 = vmatprep.subr.bf16.mxu0 %v3589_v8  ;;  %3088 = vmatprep.subr.bf16.mxu1 %v3599_v11 }
 0x94c   :  { %3058 = vmatpush1.bf16.msra.mxu0 %v3612_v15  ;;  %3090 = vmatpush1.bf16.msra.mxu1 %v3622_v19 }
 0x94d   :  { %3060 = vmatprep.subr.bf16.mxu0 %v3632_v24  ;;  %3092 = vmatprep.subr.bf16.mxu1 %v3642_v28 }
 0x950   :  { %3062 = vmatpush1.bf16.msra.mxu0 %v3655_v33  ;;  %3094 = vmatpush1.bf16.msra.mxu1 %v3665_v39 }
 0x951   :  { %3064 = vmatprep.subr.bf16.mxu0 %v3675_v43  ;;  %3096 = vmatprep.subr.bf16.mxu1 %v3685_v46 }
 0x954   :  { %3066 = vmatpush1.bf16.msra.mxu0 %v3698_v52  ;;  %3098 = vmatpush1.bf16.msra.mxu1 %v3708_v56 }
 0x955   :  { %3068 = vmatprep.subr.bf16.mxu0 %v3718_v60  ;;  %3100 = vmatprep.subr.bf16.mxu1 %v3728_v0 }
 0x958   :  { %3070 = vmatpush1.bf16.msra.mxu0 %v3735_v4  ;;  %3102 = vmatpush1.bf16.msra.mxu1 %v3739_v6 }
 0xa0e   :  { %v2042_v3 = vpop.f32.mrb[18].mxu0  ;;  %v2113_v22 = vpop.f32.mrb[18].mxu1 }
 0xa0f   :  { %v2043_v25 = vadd.f32 %v2042_v3, %v4177_v53  ;;  %v2044_v29 = vpop.f32.mrb[19].mxu0  ;;  %v2115_v34 = vpop.f32.mrb[19].mxu1  ;;  %v2114_v47 = vadd.f32 %v2113_v22, %v4187_v57 }
 0xa10   :  { %v2045_v35 = vadd.f32 %v2044_v29, %v4181_v59  ;;  %v2116_v50 = vadd.f32 %v2115_v34, %v4191_v10 }
 0xa11   :  { %v2381_v38 = vmul.f32 -1.442695, %v2043_v25  ;;  %v2383_v54 = vmul.f32 -1.442695, %v2114_v47 }
 0xa12   :  { %v2382_v42 = vmul.f32 -1.442695, %v2045_v35 }
 0xa13   :  { %3312 = vpow2.f32 %v2381_v38 }
 0xa14   :  { %3314 = vpow2.f32 %v2382_v42 }
 0xa15   :  { %3316 = vtanh.f32 %v2116_v50 }
 0xa16   :  { %3318 = vpow2.f32 %v2383_v54 }
 0xa1d   :  { %v3313_v58 = vpop.eup %3312 }
 0xa1e   :  { %v2127_v61 = vadd.f32 1.0, %v3313_v58  ;;  %v3315_v1 = vpop.eup %3314 }
 0xa1f   :  { %v2128_v5 = vadd.f32 1.0, %v3315_v1  ;;  %v3317_v8 = vpop.eup %3316 }
 0xa20   :  { %3320 = vrcp.f32 %v2127_v61  ;;  %v3319_v11 = vpop.eup %3318 }
 0xa21   :  { %3322 = vrcp.f32 %v2128_v5  ;;  %v2129_v28 = vadd.f32 1.0, %v3319_v11 }
 0xa23   :  { %3324 = vrcp.f32 %v2129_v28 }
 0xa2a   :  { %v3321_v15 = vpop.eup %3320 }
 0xa2b   :  { %v2138_v19 = vmul.f32 %v3321_v15, %v3317_v8  ;;  %v3323_v24 = vpop.eup %3322 }
 0xa2c   :  { %v2137_v33 = vmul.f32 %v3323_v24, %v4196_v51 }
 0xa2d   :  { %v3325_v43 = vpop.eup %3324 }
 0xa2e   :  { %v2139_v39 = vadd.f32 %v2138_v19, %v2137_v33 }
 0xa30   :  { %2385 = vst [vmem:[%s4273_s6 + $0x10] sm:$0xff] %v2139_v39  ;;  %3326 = vtanh.f32 %v2139_v39 }
 0xa3a   :  { %v3327_v46 = vpop.eup %3326 }
 0xa3b   :  { %v2141_v52 = vmul.f32 %v3327_v46, %v3325_v43 }
 0xa3d   :  { %2142 = vst [vmem:[%s4272_s4 + $0x30] sm:$0xff] %v2141_v52  ;;  %2384 = vst [vmem:[%s4274_s5 + $0x10] sm:$0xff] %v2141_v52  ;;  %2212 = vmatmul.mubr.f32.vlgmr.msra.gmra.mrb[20].mxu0 %v2141_v52  ;;  %2283 = vmatmul.mubr.f32.vlgmr.msra.gmra.mrb[20].mxu1 %v2141_v52 }
 0xb10   :  { %v2213_v56 = vpop.f32.mrb[20].mxu0  ;;  %v2284_v60 = vpop.f32.mrb[20].mxu1 }
 0xb11   :  { %v2214_v0 = vadd.f32 %v2213_v56, %v4177_v53  ;;  %v2215_v4 = vpop.f32.mrb[21].mxu0  ;;  %v2286_v6 = vpop.f32.mrb[21].mxu1  ;;  %v2285_v62 = vadd.f32 %v2284_v60, %v4187_v57 }
 0xb12   :  { %v2216_v36 = vadd.f32 %v2215_v4, %v4181_v59  ;;  %v2287_v2 = vadd.f32 %v2286_v6, %v4191_v10 }
 0xb13   :  { %v2386_v7 = vmul.f32 -1.442695, %v2214_v0  ;;  %v2388_v63 = vmul.f32 -1.442695, %v2285_v62 }
 0xb14   :  { %v2387_v49 = vmul.f32 -1.442695, %v2216_v36 }
 0xb15   :  { %3328 = vpow2.f32 %v2386_v7 }
 0xb16   :  { %3330 = vpow2.f32 %v2387_v49 }
 0xb17   :  { %3332 = vtanh.f32 %v2287_v2 }
 0xb18   :  { %3334 = vpow2.f32 %v2388_v63 }
 0xb1f   :  { %v3329_v18 = vpop.eup %3328 }
 0xb20   :  { %v2298_v17 = vadd.f32 1.0, %v3329_v18  ;;  %v3331_v21 = vpop.eup %3330 }
 0xb21   :  { %v2299_v53 = vadd.f32 1.0, %v3331_v21  ;;  %v3333_v12 = vpop.eup %3332 }
 0xb22   :  { %3336 = vrcp.f32 %v2298_v17  ;;  %v3335_v23 = vpop.eup %3334 }
 0xb23   :  { %3338 = vrcp.f32 %v2299_v53  ;;  %v2300_v31 = vadd.f32 1.0, %v3335_v23 }
 0xb25   :  { %3340 = vrcp.f32 %v2300_v31 }
 0xb2c   :  { %v3337_v59 = vpop.eup %3336 }
 0xb2d   :  { %v2309_v13 = vmul.f32 %v3337_v59, %v3333_v12  ;;  %v3339_v30 = vpop.eup %3338 }
 0xb2e   :  { %v2308_v32 = vmul.f32 %v3339_v30, %v2139_v39 }
 0xb2f   :  { %v3341_v57 = vpop.eup %3340 }
 0xb30   :  { %v2310_v45 = vadd.f32 %v2309_v13, %v2308_v32 }
 0xb32   :  { %3342 = vtanh.f32 %v2310_v45  ;;  %2390 = vst [vmem:[%s4273_s6 + $0x18] sm:$0xff] %v2310_v45 }
 0xb3c   :  { %v3343_v10 = vpop.eup %3342 }
 0xb3d   :  { %v2312_v14 = vmul.f32 %v3343_v10, %v3341_v57 }
 0xb3f   :  { %2313 = vst [vmem:[%s4272_s4 + $0x38] sm:$0xff] %v2312_v14  ;;  %2389 = vst [vmem:[%s4274_s5 + $0x18] sm:$0xff] %v2312_v14 }

</bundles_post_ra>
